<compile_context>
chip_gen: v5e
topology: v5e:2x2
jax: 0.10.0
libtpu: 0.0.40
codegen_flags: <defaults>
</compile_context>

<pallas_src>
import functools

import jax
import jax.numpy as jnp
from jax.experimental import pallas as pl
from jax.experimental.pallas import tpu as pltpu


_COMPILER_PARAMS = pltpu.CompilerParams(
    dimension_semantics=("parallel",),      # grid axis = batch image
    vmem_limit_bytes=32 * 1024 * 1024,      # explicit; headroom on v7x (64 MiB)
)


# ----------------------------------------------------------------------------
# Pallas kernels
# ----------------------------------------------------------------------------
def _make_conv3x3_kernel(Cin, Cout, OH, OW, fuse_input_bn):
    """conv3x3 (valid, stride 1) + bias, optional fused input BN-affine+ReLU
    prologue, and per-image BN-statistics epilogue.  Everything stays 2-D."""

    def kernel(*refs):
        if fuse_input_bn:
            x_ref, sc_ref, sh_ref, w_ref, b_ref, y_ref, st_ref = refs
        else:
            x_ref, w_ref, b_ref, y_ref, st_ref = refs

        x = x_ref[0].astype(jnp.float32)                     # (Hin, Win*Cin)
        if fuse_input_bn:
            # BN (folded to a per-lane affine) + ReLU of the previous layer,
            # applied here so that intermediate never makes an extra HBM pass.
            x = jnp.maximum(x * sc_ref[...] + sh_ref[...], 0.0)
        xb = x.astype(jnp.bfloat16)                          # MXU operand

        # Fused im2col: 9 shifted slices of the resident tile, each one MXU dot
        # against its block-diagonal tap weight; f32 accumulation.
        acc = jnp.zeros((OH, OW * Cout), jnp.float32)
        t = 0
        for di in range(3):
            for dj in range(3):
                s = xb[di:di + OH, dj * Cin: dj * Cin + OW * Cin]  # (OH, OW*Cin)
                acc = acc + jnp.dot(s, w_ref[t],
                                    preferred_element_type=jnp.float32)
                t += 1
        acc = acc + b_ref[...]                               # (1, OW*Cout) bias

        y_ref[0] = acc.astype(y_ref.dtype)                   # lane-dense store

        # BN statistics epilogue (per-image per-channel sum / sum-of-squares).
        # Every element of `acc` is a valid conv output -> no masking needed.
        acc2 = acc * acc
        ch_s = jnp.zeros((OH, Cout), jnp.float32)
        ch_q = jnp.zeros((OH, Cout), jnp.float32)
        for ow in range(OW):
            ch_s = ch_s + acc[:, ow * Cout:(ow + 1) * Cout]
            ch_q = ch_q + acc2[:, ow * Cout:(ow + 1) * Cout]
        srow = jnp.sum(ch_s, axis=0, keepdims=True)          # (1, Cout)
        qrow = jnp.sum(ch_q, axis=0, keepdims=True)          # (1, Cout)
        st_ref[0] = jnp.concatenate([srow, qrow], axis=1)    # (1, 2*Cout)

    return kernel


def _deconv2x2_kernel(x_ref, sc_ref, sh_ref, w_ref, b_ref, o_ref):
    """BN-affine+ReLU prologue + ConvTranspose2d(kernel=2, stride=2).
    The two output-row parities (2*i + di) are produced by two MXU dots whose
    structured weights already contain the W/C output interleave."""
    x = x_ref[0].astype(jnp.float32)                         # (Hin, Win*C)
    x = jnp.maximum(x * sc_ref[...] + sh_ref[...], 0.0)
    xb = x.astype(jnp.bfloat16)
    for di in range(2):
        r = jnp.dot(xb, w_ref[di], preferred_element_type=jnp.float32)
        o_ref[0, di] = r + b_ref[...]                        # (Hin, 2*Win*Cout)


# ----------------------------------------------------------------------------
# Pallas wrappers
# ----------------------------------------------------------------------------
def fused_conv3x3(x, w_taps, bias_lanes, Cin, Cout,
                  scale_lanes=None, shift_lanes=None):
    """x: (N, Hin, Win*Cin).  w_taps: (9, OW*Cin, OW*Cout) bf16.
    Returns (y, stats): y (N, OH, OW*Cout) bf16 lane-packed conv output,
    stats (N, 1, 2*Cout) f32 = per-image [channel sum | channel sum-of-squares]."""
    N, Hin, WC = x.shape
    Win = WC // Cin
    OH, OW = Hin - 2, Win - 2
    fuse = scale_lanes is not None

    kernel = _make_conv3x3_kernel(Cin, Cout, OH, OW, fuse)

    inputs = [x]
    in_specs = [pl.BlockSpec((1, Hin, WC), lambda n: (n, 0, 0))]
    if fuse:
        inputs += [scale_lanes, shift_lanes]
        in_specs += [pl.BlockSpec((1, WC), lambda n: (0, 0)),
                     pl.BlockSpec((1, WC), lambda n: (0, 0))]
    inputs += [w_taps, bias_lanes]
    in_specs += [pl.BlockSpec((9, OW * Cin, OW * Cout), lambda n: (0, 0, 0)),
                 pl.BlockSpec((1, OW * Cout), lambda n: (0, 0))]

    return pl.pallas_call(
        kernel,
        out_shape=(jax.ShapeDtypeStruct((N, OH, OW * Cout), jnp.bfloat16),
                   jax.ShapeDtypeStruct((N, 1, 2 * Cout), jnp.float32)),
        grid=(N,),
        in_specs=in_specs,
        out_specs=(pl.BlockSpec((1, OH, OW * Cout), lambda n: (n, 0, 0)),
                   pl.BlockSpec((1, 1, 2 * Cout), lambda n: (n, 0, 0))),
        compiler_params=_COMPILER_PARAMS,
    )(*inputs)


def fused_deconv2x2(x, w_rows, bias_lanes, scale_lanes, shift_lanes, C, Cout):
    """x: (N, Hin, Win*C).  Returns (N, 2, Hin, 2*Win*Cout) f32 where dim 1 is
    the output-row parity di (output row = 2*i + di), lanes = (2*j+dj)*Cout+co."""
    N, Hin, WC = x.shape
    Win = WC // C
    L = 2 * Win * Cout
    return pl.pallas_call(
        _deconv2x2_kernel,
        out_shape=jax.ShapeDtypeStruct((N, 2, Hin, L), jnp.float32),
        grid=(N,),
        in_specs=[pl.BlockSpec((1, Hin, WC), lambda n: (n, 0, 0)),
                  pl.BlockSpec((1, WC), lambda n: (0, 0)),
                  pl.BlockSpec((1, WC), lambda n: (0, 0)),
                  pl.BlockSpec((2, WC, L), lambda n: (0, 0, 0)),
                  pl.BlockSpec((1, L), lambda n: (0, 0))],
        out_specs=pl.BlockSpec((1, 2, Hin, L), lambda n: (n, 0, 0, 0)),
        compiler_params=_COMPILER_PARAMS,
    )(x, scale_lanes, shift_lanes, w_rows, bias_lanes)


# ----------------------------------------------------------------------------
# Host-side weight preprocessing (done once per spatial size in a real model;
# constant-folded under jit here) and tiny BN-statistics folding.
# ----------------------------------------------------------------------------
def _conv_tap_weights(w_oihw, OW):
    """(Cout, Cin, 3, 3) -> (9, OW*Cin, OW*Cout) bf16 block-diagonal per-tap
    matrices acting on lane-packed (.., OW*Cin) activation slices."""
    eye = jnp.eye(OW, dtype=jnp.float32)
    taps = []
    for di in range(3):
        for dj in range(3):
            blk = w_oihw[:, :, di, dj].T.astype(jnp.float32)   # (Cin, Cout)
            taps.append(jnp.kron(eye, blk))                    # (OW*Cin, OW*Cout)
    return jnp.stack(taps, axis=0).astype(jnp.bfloat16)


def _deconv_row_weights(wt_iohw, OW):
    """(Cin, Cout, 2, 2) -> (2, OW*Cin, 2*OW*Cout) bf16.  Matrix `di` maps a
    lane-packed input row to output row 2*i+di with the W/C interleave built in."""
    Cin, Cout = wt_iohw.shape[:2]
    rows = []
    for di in range(2):
        m = jnp.zeros((OW * Cin, 2 * OW * Cout), jnp.float32)
        for dj in range(2):
            sel = jnp.zeros((OW, 2 * OW), jnp.float32)
            sel = sel.at[jnp.arange(OW), 2 * jnp.arange(OW) + dj].set(1.0)
            m = m + jnp.kron(sel, wt_iohw[:, :, di, dj].astype(jnp.float32))
        rows.append(m)
    return jnp.stack(rows, axis=0).astype(jnp.bfloat16)


def _bn_scale_shift(stats, gamma, beta, count, eps=1e-5):
    """Fold training-mode BatchNorm (batch mean, biased variance, eps=1e-5)
    into a per-channel affine.  `stats` is (N, 1, 2*C); a few dozen scalars."""
    C = gamma.shape[0]
    tot = jnp.sum(stats, axis=(0, 1))                # (2*C,)
    mean = tot[:C] / count
    var = jnp.maximum(tot[C:] / count - mean * mean, 0.0)
    scale = gamma * jax.lax.rsqrt(var + eps)
    shift = beta - mean * scale
    return scale, shift


# ----------------------------------------------------------------------------
# Forward pass
# ----------------------------------------------------------------------------
def decoder_block_forward(x_nchw, params):
    N, Cin, H, W = x_nchw.shape
    Cmid = params["w1"].shape[0]
    Cout = params["wt"].shape[1]
    OH1, OW1 = H - 2, W - 2
    OH2, OW2 = OH1 - 2, OW1 - 2

    # Single cheap layout change of the network input: NCHW -> lane-packed rows.
    x0 = x_nchw.astype(jnp.float32).transpose(0, 2, 3, 1).reshape(N, H, W * Cin)

    # Structured weights / lane-tiled biases.
    bd1 = _conv_tap_weights(params["w1"], OW1)
    bd2 = _conv_tap_weights(params["w2"], OW2)
    wtr = _deconv_row_weights(params["wt"], OW2)
    b1l = jnp.tile(params["b1"], OW1)[None, :]
    b2l = jnp.tile(params["b2"], OW2)[None, :]
    btl = jnp.tile(params["bt"], 2 * OW2)[None, :]

    # conv1 + bias, with fused BN1 statistics epilogue.
    y1, st1 = fused_conv3x3(x0, bd1, b1l, Cin, Cmid)
    s1, t1 = _bn_scale_shift(st1, params["g1"], params["be1"], N * OH1 * OW1)

    # BN1+ReLU fused into conv2's prologue; conv2 + bias + BN2 statistics.
    y2, st2 = fused_conv3x3(y1, bd2, b2l, Cmid, Cmid,
                            jnp.tile(s1, OW1)[None, :],
                            jnp.tile(t1, OW1)[None, :])
    s2, t2 = _bn_scale_shift(st2, params["g2"], params["be2"], N * OH2 * OW2)

    # BN2+ReLU fused into the transposed-conv prologue.
    z = fused_deconv2x2(y2, wtr, btl,
                        jnp.tile(s2, OW2)[None, :],
                        jnp.tile(t2, OW2)[None, :],
                        Cmid, Cout)

    # Single final rearrangement to the PyTorch NCHW layout.
    z = z.reshape(N, 2, OH2, 2 * OW2, Cout)                # (n, di, i, 2j+dj, co)
    return z.transpose(0, 4, 2, 1, 3).reshape(N, Cout, 2 * OH2, 2 * OW2)


def init_params(key, in_channels, middle_channels, out_channels):
    ks = jax.random.split(key, 6)
    return {
        "w1": 0.1 * jax.random.normal(ks[0], (middle_channels, in_channels, 3, 3), jnp.float32),
        "b1": 0.05 * jax.random.normal(ks[1], (middle_channels,), jnp.float32),
        "g1": jnp.ones((middle_channels,), jnp.float32),    # BN weight (PyTorch default)
        "be1": jnp.zeros((middle_channels,), jnp.float32),  # BN bias   (PyTorch default)
        "w2": 0.1 * jax.random.normal(ks[2], (middle_channels, middle_channels, 3, 3), jnp.float32),
        "b2": 0.05 * jax.random.normal(ks[3], (middle_channels,), jnp.float32),
        "g2": jnp.ones((middle_channels,), jnp.float32),
        "be2": jnp.zeros((middle_channels,), jnp.float32),
        "wt": 0.1 * jax.random.normal(ks[4], (middle_channels, out_channels, 2, 2), jnp.float32),
        "bt": 0.05 * jax.random.normal(ks[5], (out_channels,), jnp.float32),
    }


if __name__ == "__main__":
    key = jax.random.PRNGKey(0)
    kx, kp = jax.random.split(key)

    in_channels, middle_channels, out_channels = 4, 8, 4
    N, H, W = 2, 16, 16
    x = jax.random.normal(kx, (N, in_channels, H, W), jnp.float32)   # NCHW, like PyTorch

    params = init_params(kp, in_channels, middle_channels, out_channels)

    fwd = jax.jit(functools.partial(decoder_block_forward, params=params))
    out = fwd(x)
    out = jax.block_until_ready(out)

    # 16 -> 14 (conv3x3) -> 12 (conv3x3) -> 24 (convT k=2 s=2)
    assert out.shape == (N, out_channels, 24, 24), out.shape
    assert bool(jnp.all(jnp.isfinite(out)))
    print("KERNEL_OK")
</pallas_src>

<mosaic_0001>
module attributes {stable_mosaic.version = 11 : i64} {
  func.func @kernel(%arg0: i32, %arg1: memref<1x16x64xf32, #tpu.memory_space<vmem>>, %arg2: memref<9x56x112xbf16, #tpu.memory_space<vmem>>, %arg3: memref<1x112xf32, #tpu.memory_space<vmem>>, %arg4: memref<1x14x112xbf16, #tpu.memory_space<vmem>>, %arg5: memref<1x1x16xf32, #tpu.memory_space<vmem>>) attributes {dimension_semantics = [#tpu.dimension_semantics<parallel>], iteration_bounds = array<i64: 2>, scalar_prefetch = 0 : i64, scratch_operands = 0 : i64, tpu.core_type = #tpu.core_type<tc>, window_params = [{transform_indices = @transform_0, window_bounds = array<i64: 1, 16, 64>}, {pipeline_mode = #tpu.pipeline_mode<synchronous>, transform_indices = @transform_1, window_bounds = array<i64: 9, 56, 112>}, {pipeline_mode = #tpu.pipeline_mode<synchronous>, transform_indices = @transform_2, window_bounds = array<i64: 1, 112>}, {transform_indices = @transform_3, window_bounds = array<i64: 1, 14, 112>}, {transform_indices = @transform_4, window_bounds = array<i64: 1, 1, 16>}]} {
    %c0 = arith.constant 0 : index
    %c0_0 = arith.constant 0 : index
    %c0_1 = arith.constant 0 : index
    %0 = vector.load %arg1[%c0, %c0_0, %c0_1] : memref<1x16x64xf32, #tpu.memory_space<vmem>>, vector<1x16x64xf32>
    %1 = vector.shape_cast %0 : vector<1x16x64xf32> to vector<16x64xf32>
    %2 = arith.truncf %1 : vector<16x64xf32> to vector<16x64xbf16>
    %cst = arith.constant 0.000000e+00 : f32
    %3 = vector.broadcast %cst : f32 to vector<14x112xf32>
    %4 = vector.extract_strided_slice %2 {offsets = [0, 0], sizes = [14, 56], strides = [1, 1]} : vector<16x64xbf16> to vector<14x56xbf16>
    %c0_2 = arith.constant 0 : index
    %c0_3 = arith.constant 0 : index
    %c0_4 = arith.constant 0 : index
    %5 = vector.load %arg2[%c0_2, %c0_3, %c0_4] : memref<9x56x112xbf16, #tpu.memory_space<vmem>>, vector<1x56x112xbf16>
    %6 = vector.shape_cast %5 : vector<1x56x112xbf16> to vector<56x112xbf16>
    %cst_5 = arith.constant dense<0.000000e+00> : vector<14x112xf32>
    %7 = tpu.matmul %4, %6, %cst_5 {dimension_numbers = #tpu.dot_dimension_numbers<[1], [0], [0], [1], [0, 0, 1, 1], [], []>} : vector<14x56xbf16>, vector<56x112xbf16>, vector<14x112xf32> -> vector<14x112xf32>
    %8 = arith.addf %3, %7 : vector<14x112xf32>
    %9 = vector.extract_strided_slice %2 {offsets = [0, 4], sizes = [14, 56], strides = [1, 1]} : vector<16x64xbf16> to vector<14x56xbf16>
    %c1 = arith.constant 1 : index
    %c0_6 = arith.constant 0 : index
    %c0_7 = arith.constant 0 : index
    %10 = vector.load %arg2[%c1, %c0_6, %c0_7] : memref<9x56x112xbf16, #tpu.memory_space<vmem>>, vector<1x56x112xbf16>
    %11 = vector.shape_cast %10 : vector<1x56x112xbf16> to vector<56x112xbf16>
    %cst_8 = arith.constant dense<0.000000e+00> : vector<14x112xf32>
    %12 = tpu.matmul %9, %11, %cst_8 {dimension_numbers = #tpu.dot_dimension_numbers<[1], [0], [0], [1], [0, 0, 1, 1], [], []>} : vector<14x56xbf16>, vector<56x112xbf16>, vector<14x112xf32> -> vector<14x112xf32>
    %13 = arith.addf %8, %12 : vector<14x112xf32>
    %14 = vector.extract_strided_slice %2 {offsets = [0, 8], sizes = [14, 56], strides = [1, 1]} : vector<16x64xbf16> to vector<14x56xbf16>
    %c2 = arith.constant 2 : index
    %c0_9 = arith.constant 0 : index
    %c0_10 = arith.constant 0 : index
    %15 = vector.load %arg2[%c2, %c0_9, %c0_10] : memref<9x56x112xbf16, #tpu.memory_space<vmem>>, vector<1x56x112xbf16>
    %16 = vector.shape_cast %15 : vector<1x56x112xbf16> to vector<56x112xbf16>
    %cst_11 = arith.constant dense<0.000000e+00> : vector<14x112xf32>
    %17 = tpu.matmul %14, %16, %cst_11 {dimension_numbers = #tpu.dot_dimension_numbers<[1], [0], [0], [1], [0, 0, 1, 1], [], []>} : vector<14x56xbf16>, vector<56x112xbf16>, vector<14x112xf32> -> vector<14x112xf32>
    %18 = arith.addf %13, %17 : vector<14x112xf32>
    %19 = vector.extract_strided_slice %2 {offsets = [1, 0], sizes = [14, 56], strides = [1, 1]} : vector<16x64xbf16> to vector<14x56xbf16>
    %c3 = arith.constant 3 : index
    %c0_12 = arith.constant 0 : index
    %c0_13 = arith.constant 0 : index
    %20 = vector.load %arg2[%c3, %c0_12, %c0_13] : memref<9x56x112xbf16, #tpu.memory_space<vmem>>, vector<1x56x112xbf16>
    %21 = vector.shape_cast %20 : vector<1x56x112xbf16> to vector<56x112xbf16>
    %cst_14 = arith.constant dense<0.000000e+00> : vector<14x112xf32>
    %22 = tpu.matmul %19, %21, %cst_14 {dimension_numbers = #tpu.dot_dimension_numbers<[1], [0], [0], [1], [0, 0, 1, 1], [], []>} : vector<14x56xbf16>, vector<56x112xbf16>, vector<14x112xf32> -> vector<14x112xf32>
    %23 = arith.addf %18, %22 : vector<14x112xf32>
    %24 = vector.extract_strided_slice %2 {offsets = [1, 4], sizes = [14, 56], strides = [1, 1]} : vector<16x64xbf16> to vector<14x56xbf16>
    %c4 = arith.constant 4 : index
    %c0_15 = arith.constant 0 : index
    %c0_16 = arith.constant 0 : index
    %25 = vector.load %arg2[%c4, %c0_15, %c0_16] : memref<9x56x112xbf16, #tpu.memory_space<vmem>>, vector<1x56x112xbf16>
    %26 = vector.shape_cast %25 : vector<1x56x112xbf16> to vector<56x112xbf16>
    %cst_17 = arith.constant dense<0.000000e+00> : vector<14x112xf32>
    %27 = tpu.matmul %24, %26, %cst_17 {dimension_numbers = #tpu.dot_dimension_numbers<[1], [0], [0], [1], [0, 0, 1, 1], [], []>} : vector<14x56xbf16>, vector<56x112xbf16>, vector<14x112xf32> -> vector<14x112xf32>
    %28 = arith.addf %23, %27 : vector<14x112xf32>
    %29 = vector.extract_strided_slice %2 {offsets = [1, 8], sizes = [14, 56], strides = [1, 1]} : vector<16x64xbf16> to vector<14x56xbf16>
    %c5 = arith.constant 5 : index
    %c0_18 = arith.constant 0 : index
    %c0_19 = arith.constant 0 : index
    %30 = vector.load %arg2[%c5, %c0_18, %c0_19] : memref<9x56x112xbf16, #tpu.memory_space<vmem>>, vector<1x56x112xbf16>
    %31 = vector.shape_cast %30 : vector<1x56x112xbf16> to vector<56x112xbf16>
    %cst_20 = arith.constant dense<0.000000e+00> : vector<14x112xf32>
    %32 = tpu.matmul %29, %31, %cst_20 {dimension_numbers = #tpu.dot_dimension_numbers<[1], [0], [0], [1], [0, 0, 1, 1], [], []>} : vector<14x56xbf16>, vector<56x112xbf16>, vector<14x112xf32> -> vector<14x112xf32>
    %33 = arith.addf %28, %32 : vector<14x112xf32>
    %34 = vector.extract_strided_slice %2 {offsets = [2, 0], sizes = [14, 56], strides = [1, 1]} : vector<16x64xbf16> to vector<14x56xbf16>
    %c6 = arith.constant 6 : index
    %c0_21 = arith.constant 0 : index
    %c0_22 = arith.constant 0 : index
    %35 = vector.load %arg2[%c6, %c0_21, %c0_22] : memref<9x56x112xbf16, #tpu.memory_space<vmem>>, vector<1x56x112xbf16>
    %36 = vector.shape_cast %35 : vector<1x56x112xbf16> to vector<56x112xbf16>
    %cst_23 = arith.constant dense<0.000000e+00> : vector<14x112xf32>
    %37 = tpu.matmul %34, %36, %cst_23 {dimension_numbers = #tpu.dot_dimension_numbers<[1], [0], [0], [1], [0, 0, 1, 1], [], []>} : vector<14x56xbf16>, vector<56x112xbf16>, vector<14x112xf32> -> vector<14x112xf32>
    %38 = arith.addf %33, %37 : vector<14x112xf32>
    %39 = vector.extract_strided_slice %2 {offsets = [2, 4], sizes = [14, 56], strides = [1, 1]} : vector<16x64xbf16> to vector<14x56xbf16>
    %c7 = arith.constant 7 : index
    %c0_24 = arith.constant 0 : index
    %c0_25 = arith.constant 0 : index
    %40 = vector.load %arg2[%c7, %c0_24, %c0_25] : memref<9x56x112xbf16, #tpu.memory_space<vmem>>, vector<1x56x112xbf16>
    %41 = vector.shape_cast %40 : vector<1x56x112xbf16> to vector<56x112xbf16>
    %cst_26 = arith.constant dense<0.000000e+00> : vector<14x112xf32>
    %42 = tpu.matmul %39, %41, %cst_26 {dimension_numbers = #tpu.dot_dimension_numbers<[1], [0], [0], [1], [0, 0, 1, 1], [], []>} : vector<14x56xbf16>, vector<56x112xbf16>, vector<14x112xf32> -> vector<14x112xf32>
    %43 = arith.addf %38, %42 : vector<14x112xf32>
    %44 = vector.extract_strided_slice %2 {offsets = [2, 8], sizes = [14, 56], strides = [1, 1]} : vector<16x64xbf16> to vector<14x56xbf16>
    %c8 = arith.constant 8 : index
    %c0_27 = arith.constant 0 : index
    %c0_28 = arith.constant 0 : index
    %45 = vector.load %arg2[%c8, %c0_27, %c0_28] : memref<9x56x112xbf16, #tpu.memory_space<vmem>>, vector<1x56x112xbf16>
    %46 = vector.shape_cast %45 : vector<1x56x112xbf16> to vector<56x112xbf16>
    %cst_29 = arith.constant dense<0.000000e+00> : vector<14x112xf32>
    %47 = tpu.matmul %44, %46, %cst_29 {dimension_numbers = #tpu.dot_dimension_numbers<[1], [0], [0], [1], [0, 0, 1, 1], [], []>} : vector<14x56xbf16>, vector<56x112xbf16>, vector<14x112xf32> -> vector<14x112xf32>
    %48 = arith.addf %43, %47 : vector<14x112xf32>
    %c0_30 = arith.constant 0 : index
    %c0_31 = arith.constant 0 : index
    %49 = vector.load %arg3[%c0_30, %c0_31] : memref<1x112xf32, #tpu.memory_space<vmem>>, vector<1x112xf32>
    %50 = vector.broadcast %49 : vector<1x112xf32> to vector<14x112xf32>
    %51 = arith.addf %48, %50 : vector<14x112xf32>
    %52 = arith.truncf %51 : vector<14x112xf32> to vector<14x112xbf16>
    %c0_32 = arith.constant 0 : index
    %c0_33 = arith.constant 0 : index
    %c0_34 = arith.constant 0 : index
    %53 = vector.load %arg4[%c0_32, %c0_33, %c0_34] : memref<1x14x112xbf16, #tpu.memory_space<vmem>>, vector<1x14x112xbf16>
    %54 = vector.shape_cast %53 : vector<1x14x112xbf16> to vector<14x112xbf16>
    %55 = vector.shape_cast %52 : vector<14x112xbf16> to vector<1x14x112xbf16>
    tpu.vector_store %arg4[%c0_32, %c0_33, %c0_34], %55 {strides = array<i32>} : memref<1x14x112xbf16, #tpu.memory_space<vmem>>, vector<1x14x112xbf16>,
    %56 = arith.mulf %51, %51 : vector<14x112xf32>
    %cst_35 = arith.constant 0.000000e+00 : f32
    %57 = vector.broadcast %cst_35 : f32 to vector<14x8xf32>
    %cst_36 = arith.constant 0.000000e+00 : f32
    %58 = vector.broadcast %cst_36 : f32 to vector<14x8xf32>
    %59 = vector.extract_strided_slice %51 {offsets = [0, 0], sizes = [14, 8], strides = [1, 1]} : vector<14x112xf32> to vector<14x8xf32>
    %60 = arith.addf %57, %59 : vector<14x8xf32>
    %61 = vector.extract_strided_slice %56 {offsets = [0, 0], sizes = [14, 8], strides = [1, 1]} : vector<14x112xf32> to vector<14x8xf32>
    %62 = arith.addf %58, %61 : vector<14x8xf32>
    %63 = vector.extract_strided_slice %51 {offsets = [0, 8], sizes = [14, 8], strides = [1, 1]} : vector<14x112xf32> to vector<14x8xf32>
    %64 = arith.addf %60, %63 : vector<14x8xf32>
    %65 = vector.extract_strided_slice %56 {offsets = [0, 8], sizes = [14, 8], strides = [1, 1]} : vector<14x112xf32> to vector<14x8xf32>
    %66 = arith.addf %62, %65 : vector<14x8xf32>
    %67 = vector.extract_strided_slice %51 {offsets = [0, 16], sizes = [14, 8], strides = [1, 1]} : vector<14x112xf32> to vector<14x8xf32>
    %68 = arith.addf %64, %67 : vector<14x8xf32>
    %69 = vector.extract_strided_slice %56 {offsets = [0, 16], sizes = [14, 8], strides = [1, 1]} : vector<14x112xf32> to vector<14x8xf32>
    %70 = arith.addf %66, %69 : vector<14x8xf32>
    %71 = vector.extract_strided_slice %51 {offsets = [0, 24], sizes = [14, 8], strides = [1, 1]} : vector<14x112xf32> to vector<14x8xf32>
    %72 = arith.addf %68, %71 : vector<14x8xf32>
    %73 = vector.extract_strided_slice %56 {offsets = [0, 24], sizes = [14, 8], strides = [1, 1]} : vector<14x112xf32> to vector<14x8xf32>
    %74 = arith.addf %70, %73 : vector<14x8xf32>
    %75 = vector.extract_strided_slice %51 {offsets = [0, 32], sizes = [14, 8], strides = [1, 1]} : vector<14x112xf32> to vector<14x8xf32>
    %76 = arith.addf %72, %75 : vector<14x8xf32>
    %77 = vector.extract_strided_slice %56 {offsets = [0, 32], sizes = [14, 8], strides = [1, 1]} : vector<14x112xf32> to vector<14x8xf32>
    %78 = arith.addf %74, %77 : vector<14x8xf32>
    %79 = vector.extract_strided_slice %51 {offsets = [0, 40], sizes = [14, 8], strides = [1, 1]} : vector<14x112xf32> to vector<14x8xf32>
    %80 = arith.addf %76, %79 : vector<14x8xf32>
    %81 = vector.extract_strided_slice %56 {offsets = [0, 40], sizes = [14, 8], strides = [1, 1]} : vector<14x112xf32> to vector<14x8xf32>
    %82 = arith.addf %78, %81 : vector<14x8xf32>
    %83 = vector.extract_strided_slice %51 {offsets = [0, 48], sizes = [14, 8], strides = [1, 1]} : vector<14x112xf32> to vector<14x8xf32>
    %84 = arith.addf %80, %83 : vector<14x8xf32>
    %85 = vector.extract_strided_slice %56 {offsets = [0, 48], sizes = [14, 8], strides = [1, 1]} : vector<14x112xf32> to vector<14x8xf32>
    %86 = arith.addf %82, %85 : vector<14x8xf32>
    %87 = vector.extract_strided_slice %51 {offsets = [0, 56], sizes = [14, 8], strides = [1, 1]} : vector<14x112xf32> to vector<14x8xf32>
    %88 = arith.addf %84, %87 : vector<14x8xf32>
    %89 = vector.extract_strided_slice %56 {offsets = [0, 56], sizes = [14, 8], strides = [1, 1]} : vector<14x112xf32> to vector<14x8xf32>
    %90 = arith.addf %86, %89 : vector<14x8xf32>
    %91 = vector.extract_strided_slice %51 {offsets = [0, 64], sizes = [14, 8], strides = [1, 1]} : vector<14x112xf32> to vector<14x8xf32>
    %92 = arith.addf %88, %91 : vector<14x8xf32>
    %93 = vector.extract_strided_slice %56 {offsets = [0, 64], sizes = [14, 8], strides = [1, 1]} : vector<14x112xf32> to vector<14x8xf32>
    %94 = arith.addf %90, %93 : vector<14x8xf32>
    %95 = vector.extract_strided_slice %51 {offsets = [0, 72], sizes = [14, 8], strides = [1, 1]} : vector<14x112xf32> to vector<14x8xf32>
    %96 = arith.addf %92, %95 : vector<14x8xf32>
    %97 = vector.extract_strided_slice %56 {offsets = [0, 72], sizes = [14, 8], strides = [1, 1]} : vector<14x112xf32> to vector<14x8xf32>
    %98 = arith.addf %94, %97 : vector<14x8xf32>
    %99 = vector.extract_strided_slice %51 {offsets = [0, 80], sizes = [14, 8], strides = [1, 1]} : vector<14x112xf32> to vector<14x8xf32>
    %100 = arith.addf %96, %99 : vector<14x8xf32>
    %101 = vector.extract_strided_slice %56 {offsets = [0, 80], sizes = [14, 8], strides = [1, 1]} : vector<14x112xf32> to vector<14x8xf32>
    %102 = arith.addf %98, %101 : vector<14x8xf32>
    %103 = vector.extract_strided_slice %51 {offsets = [0, 88], sizes = [14, 8], strides = [1, 1]} : vector<14x112xf32> to vector<14x8xf32>
    %104 = arith.addf %100, %103 : vector<14x8xf32>
    %105 = vector.extract_strided_slice %56 {offsets = [0, 88], sizes = [14, 8], strides = [1, 1]} : vector<14x112xf32> to vector<14x8xf32>
    %106 = arith.addf %102, %105 : vector<14x8xf32>
    %107 = vector.extract_strided_slice %51 {offsets = [0, 96], sizes = [14, 8], strides = [1, 1]} : vector<14x112xf32> to vector<14x8xf32>
    %108 = arith.addf %104, %107 : vector<14x8xf32>
    %109 = vector.extract_strided_slice %56 {offsets = [0, 96], sizes = [14, 8], strides = [1, 1]} : vector<14x112xf32> to vector<14x8xf32>
    %110 = arith.addf %106, %109 : vector<14x8xf32>
    %111 = vector.extract_strided_slice %51 {offsets = [0, 104], sizes = [14, 8], strides = [1, 1]} : vector<14x112xf32> to vector<14x8xf32>
    %112 = arith.addf %108, %111 : vector<14x8xf32>
    %113 = vector.extract_strided_slice %56 {offsets = [0, 104], sizes = [14, 8], strides = [1, 1]} : vector<14x112xf32> to vector<14x8xf32>
    %114 = arith.addf %110, %113 : vector<14x8xf32>
    %cst_37 = arith.constant dense<0.000000e+00> : vector<8xf32>
    %115 = vector.multi_reduction <add>, %112, %cst_37 [0] : vector<14x8xf32> to vector<8xf32>
    %116 = vector.shape_cast %115 : vector<8xf32> to vector<1x8xf32>
    %cst_38 = arith.constant dense<0.000000e+00> : vector<8xf32>
    %117 = vector.multi_reduction <add>, %114, %cst_38 [0] : vector<14x8xf32> to vector<8xf32>
    %118 = vector.shape_cast %117 : vector<8xf32> to vector<1x8xf32>
    %119 = tpu.concatenate %116, %118 in 1 : vector<1x8xf32>, vector<1x8xf32> -> vector<1x16xf32>
    %c0_39 = arith.constant 0 : index
    %c0_40 = arith.constant 0 : index
    %c0_41 = arith.constant 0 : index
    %120 = vector.load %arg5[%c0_39, %c0_40, %c0_41] : memref<1x1x16xf32, #tpu.memory_space<vmem>>, vector<1x1x16xf32>
    %121 = vector.shape_cast %120 : vector<1x1x16xf32> to vector<1x16xf32>
    %122 = vector.shape_cast %119 : vector<1x16xf32> to vector<1x1x16xf32>
    tpu.vector_store %arg5[%c0_39, %c0_40, %c0_41], %122 {strides = array<i32>} : memref<1x1x16xf32, #tpu.memory_space<vmem>>, vector<1x1x16xf32>,
    return
  }
  func.func @transform_0(%arg0: i32) -> (i32, i32, i32) {
    %c0_i32 = arith.constant 0 : i32
    %c0_i32_0 = arith.constant 0 : i32
    %c0_i32_1 = arith.constant 0 : i32
    return %arg0, %c0_i32, %c0_i32_0 : i32, i32, i32
  }
  func.func @transform_1(%arg0: i32) -> (i32, i32, i32) {
    %c0_i32 = arith.constant 0 : i32
    %c0_i32_0 = arith.constant 0 : i32
    %c0_i32_1 = arith.constant 0 : i32
    %c0_i32_2 = arith.constant 0 : i32
    return %c0_i32, %c0_i32_0, %c0_i32_1 : i32, i32, i32
  }
  func.func @transform_2(%arg0: i32) -> (i32, i32) {
    %c0_i32 = arith.constant 0 : i32
    %c0_i32_0 = arith.constant 0 : i32
    %c0_i32_1 = arith.constant 0 : i32
    return %c0_i32, %c0_i32_0 : i32, i32
  }
  func.func @transform_3(%arg0: i32) -> (i32, i32, i32) {
    %c0_i32 = arith.constant 0 : i32
    %c0_i32_0 = arith.constant 0 : i32
    %c0_i32_1 = arith.constant 0 : i32
    return %arg0, %c0_i32, %c0_i32_0 : i32, i32, i32
  }
  func.func @transform_4(%arg0: i32) -> (i32, i32, i32) {
    %c0_i32 = arith.constant 0 : i32
    %c0_i32_0 = arith.constant 0 : i32
    %c0_i32_1 = arith.constant 0 : i32
    return %arg0, %c0_i32, %c0_i32_0 : i32, i32, i32
  }
}

module attributes {stable_mosaic.version = 11 : i64} {
  func.func @kernel(%arg0: i32, %arg1: memref<1x14x112xbf16, #tpu.memory_space<vmem>>, %arg2: memref<1x112xf32, #tpu.memory_space<vmem>>, %arg3: memref<1x112xf32, #tpu.memory_space<vmem>>, %arg4: memref<9x96x96xbf16, #tpu.memory_space<vmem>>, %arg5: memref<1x96xf32, #tpu.memory_space<vmem>>, %arg6: memref<1x12x96xbf16, #tpu.memory_space<vmem>>, %arg7: memref<1x1x16xf32, #tpu.memory_space<vmem>>) attributes {dimension_semantics = [#tpu.dimension_semantics<parallel>], iteration_bounds = array<i64: 2>, scalar_prefetch = 0 : i64, scratch_operands = 0 : i64, tpu.core_type = #tpu.core_type<tc>, window_params = [{transform_indices = @transform_0, window_bounds = array<i64: 1, 14, 112>}, {pipeline_mode = #tpu.pipeline_mode<synchronous>, transform_indices = @transform_1, window_bounds = array<i64: 1, 112>}, {pipeline_mode = #tpu.pipeline_mode<synchronous>, transform_indices = @transform_2, window_bounds = array<i64: 1, 112>}, {pipeline_mode = #tpu.pipeline_mode<synchronous>, transform_indices = @transform_3, window_bounds = array<i64: 9, 96, 96>}, {pipeline_mode = #tpu.pipeline_mode<synchronous>, transform_indices = @transform_4, window_bounds = array<i64: 1, 96>}, {transform_indices = @transform_5, window_bounds = array<i64: 1, 12, 96>}, {transform_indices = @transform_6, window_bounds = array<i64: 1, 1, 16>}]} {
    %c0 = arith.constant 0 : index
    %c0_0 = arith.constant 0 : index
    %c0_1 = arith.constant 0 : index
    %0 = vector.load %arg1[%c0, %c0_0, %c0_1] : memref<1x14x112xbf16, #tpu.memory_space<vmem>>, vector<1x14x112xbf16>
    %1 = vector.shape_cast %0 : vector<1x14x112xbf16> to vector<14x112xbf16>
    %2 = arith.extf %1 : vector<14x112xbf16> to vector<14x112xf32>
    %c0_2 = arith.constant 0 : index
    %c0_3 = arith.constant 0 : index
    %3 = vector.load %arg2[%c0_2, %c0_3] : memref<1x112xf32, #tpu.memory_space<vmem>>, vector<1x112xf32>
    %4 = vector.broadcast %3 : vector<1x112xf32> to vector<14x112xf32>
    %5 = arith.mulf %2, %4 : vector<14x112xf32>
    %c0_4 = arith.constant 0 : index
    %c0_5 = arith.constant 0 : index
    %6 = vector.load %arg3[%c0_4, %c0_5] : memref<1x112xf32, #tpu.memory_space<vmem>>, vector<1x112xf32>
    %7 = vector.broadcast %6 : vector<1x112xf32> to vector<14x112xf32>
    %8 = arith.addf %5, %7 : vector<14x112xf32>
    %cst = arith.constant 0.000000e+00 : f32
    %9 = vector.broadcast %cst : f32 to vector<14x112xf32>
    %10 = arith.maximumf %8, %9 : vector<14x112xf32>
    %11 = arith.truncf %10 : vector<14x112xf32> to vector<14x112xbf16>
    %cst_6 = arith.constant 0.000000e+00 : f32
    %12 = vector.broadcast %cst_6 : f32 to vector<12x96xf32>
    %13 = vector.extract_strided_slice %11 {offsets = [0, 0], sizes = [12, 96], strides = [1, 1]} : vector<14x112xbf16> to vector<12x96xbf16>
    %c0_7 = arith.constant 0 : index
    %c0_8 = arith.constant 0 : index
    %c0_9 = arith.constant 0 : index
    %14 = vector.load %arg4[%c0_7, %c0_8, %c0_9] : memref<9x96x96xbf16, #tpu.memory_space<vmem>>, vector<1x96x96xbf16>
    %15 = vector.shape_cast %14 : vector<1x96x96xbf16> to vector<96x96xbf16>
    %cst_10 = arith.constant dense<0.000000e+00> : vector<12x96xf32>
    %16 = tpu.matmul %13, %15, %cst_10 {dimension_numbers = #tpu.dot_dimension_numbers<[1], [0], [0], [1], [0, 0, 1, 1], [], []>} : vector<12x96xbf16>, vector<96x96xbf16>, vector<12x96xf32> -> vector<12x96xf32>
    %17 = arith.addf %12, %16 : vector<12x96xf32>
    %18 = vector.extract_strided_slice %11 {offsets = [0, 8], sizes = [12, 96], strides = [1, 1]} : vector<14x112xbf16> to vector<12x96xbf16>
    %c1 = arith.constant 1 : index
    %c0_11 = arith.constant 0 : index
    %c0_12 = arith.constant 0 : index
    %19 = vector.load %arg4[%c1, %c0_11, %c0_12] : memref<9x96x96xbf16, #tpu.memory_space<vmem>>, vector<1x96x96xbf16>
    %20 = vector.shape_cast %19 : vector<1x96x96xbf16> to vector<96x96xbf16>
    %cst_13 = arith.constant dense<0.000000e+00> : vector<12x96xf32>
    %21 = tpu.matmul %18, %20, %cst_13 {dimension_numbers = #tpu.dot_dimension_numbers<[1], [0], [0], [1], [0, 0, 1, 1], [], []>} : vector<12x96xbf16>, vector<96x96xbf16>, vector<12x96xf32> -> vector<12x96xf32>
    %22 = arith.addf %17, %21 : vector<12x96xf32>
    %23 = vector.extract_strided_slice %11 {offsets = [0, 16], sizes = [12, 96], strides = [1, 1]} : vector<14x112xbf16> to vector<12x96xbf16>
    %c2 = arith.constant 2 : index
    %c0_14 = arith.constant 0 : index
    %c0_15 = arith.constant 0 : index
    %24 = vector.load %arg4[%c2, %c0_14, %c0_15] : memref<9x96x96xbf16, #tpu.memory_space<vmem>>, vector<1x96x96xbf16>
    %25 = vector.shape_cast %24 : vector<1x96x96xbf16> to vector<96x96xbf16>
    %cst_16 = arith.constant dense<0.000000e+00> : vector<12x96xf32>
    %26 = tpu.matmul %23, %25, %cst_16 {dimension_numbers = #tpu.dot_dimension_numbers<[1], [0], [0], [1], [0, 0, 1, 1], [], []>} : vector<12x96xbf16>, vector<96x96xbf16>, vector<12x96xf32> -> vector<12x96xf32>
    %27 = arith.addf %22, %26 : vector<12x96xf32>
    %28 = vector.extract_strided_slice %11 {offsets = [1, 0], sizes = [12, 96], strides = [1, 1]} : vector<14x112xbf16> to vector<12x96xbf16>
    %c3 = arith.constant 3 : index
    %c0_17 = arith.constant 0 : index
    %c0_18 = arith.constant 0 : index
    %29 = vector.load %arg4[%c3, %c0_17, %c0_18] : memref<9x96x96xbf16, #tpu.memory_space<vmem>>, vector<1x96x96xbf16>
    %30 = vector.shape_cast %29 : vector<1x96x96xbf16> to vector<96x96xbf16>
    %cst_19 = arith.constant dense<0.000000e+00> : vector<12x96xf32>
    %31 = tpu.matmul %28, %30, %cst_19 {dimension_numbers = #tpu.dot_dimension_numbers<[1], [0], [0], [1], [0, 0, 1, 1], [], []>} : vector<12x96xbf16>, vector<96x96xbf16>, vector<12x96xf32> -> vector<12x96xf32>
    %32 = arith.addf %27, %31 : vector<12x96xf32>
    %33 = vector.extract_strided_slice %11 {offsets = [1, 8], sizes = [12, 96], strides = [1, 1]} : vector<14x112xbf16> to vector<12x96xbf16>
    %c4 = arith.constant 4 : index
    %c0_20 = arith.constant 0 : index
    %c0_21 = arith.constant 0 : index
    %34 = vector.load %arg4[%c4, %c0_20, %c0_21] : memref<9x96x96xbf16, #tpu.memory_space<vmem>>, vector<1x96x96xbf16>
    %35 = vector.shape_cast %34 : vector<1x96x96xbf16> to vector<96x96xbf16>
    %cst_22 = arith.constant dense<0.000000e+00> : vector<12x96xf32>
    %36 = tpu.matmul %33, %35, %cst_22 {dimension_numbers = #tpu.dot_dimension_numbers<[1], [0], [0], [1], [0, 0, 1, 1], [], []>} : vector<12x96xbf16>, vector<96x96xbf16>, vector<12x96xf32> -> vector<12x96xf32>
    %37 = arith.addf %32, %36 : vector<12x96xf32>
    %38 = vector.extract_strided_slice %11 {offsets = [1, 16], sizes = [12, 96], strides = [1, 1]} : vector<14x112xbf16> to vector<12x96xbf16>
    %c5 = arith.constant 5 : index
    %c0_23 = arith.constant 0 : index
    %c0_24 = arith.constant 0 : index
    %39 = vector.load %arg4[%c5, %c0_23, %c0_24] : memref<9x96x96xbf16, #tpu.memory_space<vmem>>, vector<1x96x96xbf16>
    %40 = vector.shape_cast %39 : vector<1x96x96xbf16> to vector<96x96xbf16>
    %cst_25 = arith.constant dense<0.000000e+00> : vector<12x96xf32>
    %41 = tpu.matmul %38, %40, %cst_25 {dimension_numbers = #tpu.dot_dimension_numbers<[1], [0], [0], [1], [0, 0, 1, 1], [], []>} : vector<12x96xbf16>, vector<96x96xbf16>, vector<12x96xf32> -> vector<12x96xf32>
    %42 = arith.addf %37, %41 : vector<12x96xf32>
    %43 = vector.extract_strided_slice %11 {offsets = [2, 0], sizes = [12, 96], strides = [1, 1]} : vector<14x112xbf16> to vector<12x96xbf16>
    %c6 = arith.constant 6 : index
    %c0_26 = arith.constant 0 : index
    %c0_27 = arith.constant 0 : index
    %44 = vector.load %arg4[%c6, %c0_26, %c0_27] : memref<9x96x96xbf16, #tpu.memory_space<vmem>>, vector<1x96x96xbf16>
    %45 = vector.shape_cast %44 : vector<1x96x96xbf16> to vector<96x96xbf16>
    %cst_28 = arith.constant dense<0.000000e+00> : vector<12x96xf32>
    %46 = tpu.matmul %43, %45, %cst_28 {dimension_numbers = #tpu.dot_dimension_numbers<[1], [0], [0], [1], [0, 0, 1, 1], [], []>} : vector<12x96xbf16>, vector<96x96xbf16>, vector<12x96xf32> -> vector<12x96xf32>
    %47 = arith.addf %42, %46 : vector<12x96xf32>
    %48 = vector.extract_strided_slice %11 {offsets = [2, 8], sizes = [12, 96], strides = [1, 1]} : vector<14x112xbf16> to vector<12x96xbf16>
    %c7 = arith.constant 7 : index
    %c0_29 = arith.constant 0 : index
    %c0_30 = arith.constant 0 : index
    %49 = vector.load %arg4[%c7, %c0_29, %c0_30] : memref<9x96x96xbf16, #tpu.memory_space<vmem>>, vector<1x96x96xbf16>
    %50 = vector.shape_cast %49 : vector<1x96x96xbf16> to vector<96x96xbf16>
    %cst_31 = arith.constant dense<0.000000e+00> : vector<12x96xf32>
    %51 = tpu.matmul %48, %50, %cst_31 {dimension_numbers = #tpu.dot_dimension_numbers<[1], [0], [0], [1], [0, 0, 1, 1], [], []>} : vector<12x96xbf16>, vector<96x96xbf16>, vector<12x96xf32> -> vector<12x96xf32>
    %52 = arith.addf %47, %51 : vector<12x96xf32>
    %53 = vector.extract_strided_slice %11 {offsets = [2, 16], sizes = [12, 96], strides = [1, 1]} : vector<14x112xbf16> to vector<12x96xbf16>
    %c8 = arith.constant 8 : index
    %c0_32 = arith.constant 0 : index
    %c0_33 = arith.constant 0 : index
    %54 = vector.load %arg4[%c8, %c0_32, %c0_33] : memref<9x96x96xbf16, #tpu.memory_space<vmem>>, vector<1x96x96xbf16>
    %55 = vector.shape_cast %54 : vector<1x96x96xbf16> to vector<96x96xbf16>
    %cst_34 = arith.constant dense<0.000000e+00> : vector<12x96xf32>
    %56 = tpu.matmul %53, %55, %cst_34 {dimension_numbers = #tpu.dot_dimension_numbers<[1], [0], [0], [1], [0, 0, 1, 1], [], []>} : vector<12x96xbf16>, vector<96x96xbf16>, vector<12x96xf32> -> vector<12x96xf32>
    %57 = arith.addf %52, %56 : vector<12x96xf32>
    %c0_35 = arith.constant 0 : index
    %c0_36 = arith.constant 0 : index
    %58 = vector.load %arg5[%c0_35, %c0_36] : memref<1x96xf32, #tpu.memory_space<vmem>>, vector<1x96xf32>
    %59 = vector.broadcast %58 : vector<1x96xf32> to vector<12x96xf32>
    %60 = arith.addf %57, %59 : vector<12x96xf32>
    %61 = arith.truncf %60 : vector<12x96xf32> to vector<12x96xbf16>
    %c0_37 = arith.constant 0 : index
    %c0_38 = arith.constant 0 : index
    %c0_39 = arith.constant 0 : index
    %62 = vector.load %arg6[%c0_37, %c0_38, %c0_39] : memref<1x12x96xbf16, #tpu.memory_space<vmem>>, vector<1x12x96xbf16>
    %63 = vector.shape_cast %62 : vector<1x12x96xbf16> to vector<12x96xbf16>
    %64 = vector.shape_cast %61 : vector<12x96xbf16> to vector<1x12x96xbf16>
    tpu.vector_store %arg6[%c0_37, %c0_38, %c0_39], %64 {strides = array<i32>} : memref<1x12x96xbf16, #tpu.memory_space<vmem>>, vector<1x12x96xbf16>,
    %65 = arith.mulf %60, %60 : vector<12x96xf32>
    %cst_40 = arith.constant 0.000000e+00 : f32
    %66 = vector.broadcast %cst_40 : f32 to vector<12x8xf32>
    %cst_41 = arith.constant 0.000000e+00 : f32
    %67 = vector.broadcast %cst_41 : f32 to vector<12x8xf32>
    %68 = vector.extract_strided_slice %60 {offsets = [0, 0], sizes = [12, 8], strides = [1, 1]} : vector<12x96xf32> to vector<12x8xf32>
    %69 = arith.addf %66, %68 : vector<12x8xf32>
    %70 = vector.extract_strided_slice %65 {offsets = [0, 0], sizes = [12, 8], strides = [1, 1]} : vector<12x96xf32> to vector<12x8xf32>
    %71 = arith.addf %67, %70 : vector<12x8xf32>
    %72 = vector.extract_strided_slice %60 {offsets = [0, 8], sizes = [12, 8], strides = [1, 1]} : vector<12x96xf32> to vector<12x8xf32>
    %73 = arith.addf %69, %72 : vector<12x8xf32>
    %74 = vector.extract_strided_slice %65 {offsets = [0, 8], sizes = [12, 8], strides = [1, 1]} : vector<12x96xf32> to vector<12x8xf32>
    %75 = arith.addf %71, %74 : vector<12x8xf32>
    %76 = vector.extract_strided_slice %60 {offsets = [0, 16], sizes = [12, 8], strides = [1, 1]} : vector<12x96xf32> to vector<12x8xf32>
    %77 = arith.addf %73, %76 : vector<12x8xf32>
    %78 = vector.extract_strided_slice %65 {offsets = [0, 16], sizes = [12, 8], strides = [1, 1]} : vector<12x96xf32> to vector<12x8xf32>
    %79 = arith.addf %75, %78 : vector<12x8xf32>
    %80 = vector.extract_strided_slice %60 {offsets = [0, 24], sizes = [12, 8], strides = [1, 1]} : vector<12x96xf32> to vector<12x8xf32>
    %81 = arith.addf %77, %80 : vector<12x8xf32>
    %82 = vector.extract_strided_slice %65 {offsets = [0, 24], sizes = [12, 8], strides = [1, 1]} : vector<12x96xf32> to vector<12x8xf32>
    %83 = arith.addf %79, %82 : vector<12x8xf32>
    %84 = vector.extract_strided_slice %60 {offsets = [0, 32], sizes = [12, 8], strides = [1, 1]} : vector<12x96xf32> to vector<12x8xf32>
    %85 = arith.addf %81, %84 : vector<12x8xf32>
    %86 = vector.extract_strided_slice %65 {offsets = [0, 32], sizes = [12, 8], strides = [1, 1]} : vector<12x96xf32> to vector<12x8xf32>
    %87 = arith.addf %83, %86 : vector<12x8xf32>
    %88 = vector.extract_strided_slice %60 {offsets = [0, 40], sizes = [12, 8], strides = [1, 1]} : vector<12x96xf32> to vector<12x8xf32>
    %89 = arith.addf %85, %88 : vector<12x8xf32>
    %90 = vector.extract_strided_slice %65 {offsets = [0, 40], sizes = [12, 8], strides = [1, 1]} : vector<12x96xf32> to vector<12x8xf32>
    %91 = arith.addf %87, %90 : vector<12x8xf32>
    %92 = vector.extract_strided_slice %60 {offsets = [0, 48], sizes = [12, 8], strides = [1, 1]} : vector<12x96xf32> to vector<12x8xf32>
    %93 = arith.addf %89, %92 : vector<12x8xf32>
    %94 = vector.extract_strided_slice %65 {offsets = [0, 48], sizes = [12, 8], strides = [1, 1]} : vector<12x96xf32> to vector<12x8xf32>
    %95 = arith.addf %91, %94 : vector<12x8xf32>
    %96 = vector.extract_strided_slice %60 {offsets = [0, 56], sizes = [12, 8], strides = [1, 1]} : vector<12x96xf32> to vector<12x8xf32>
    %97 = arith.addf %93, %96 : vector<12x8xf32>
    %98 = vector.extract_strided_slice %65 {offsets = [0, 56], sizes = [12, 8], strides = [1, 1]} : vector<12x96xf32> to vector<12x8xf32>
    %99 = arith.addf %95, %98 : vector<12x8xf32>
    %100 = vector.extract_strided_slice %60 {offsets = [0, 64], sizes = [12, 8], strides = [1, 1]} : vector<12x96xf32> to vector<12x8xf32>
    %101 = arith.addf %97, %100 : vector<12x8xf32>
    %102 = vector.extract_strided_slice %65 {offsets = [0, 64], sizes = [12, 8], strides = [1, 1]} : vector<12x96xf32> to vector<12x8xf32>
    %103 = arith.addf %99, %102 : vector<12x8xf32>
    %104 = vector.extract_strided_slice %60 {offsets = [0, 72], sizes = [12, 8], strides = [1, 1]} : vector<12x96xf32> to vector<12x8xf32>
    %105 = arith.addf %101, %104 : vector<12x8xf32>
    %106 = vector.extract_strided_slice %65 {offsets = [0, 72], sizes = [12, 8], strides = [1, 1]} : vector<12x96xf32> to vector<12x8xf32>
    %107 = arith.addf %103, %106 : vector<12x8xf32>
    %108 = vector.extract_strided_slice %60 {offsets = [0, 80], sizes = [12, 8], strides = [1, 1]} : vector<12x96xf32> to vector<12x8xf32>
    %109 = arith.addf %105, %108 : vector<12x8xf32>
    %110 = vector.extract_strided_slice %65 {offsets = [0, 80], sizes = [12, 8], strides = [1, 1]} : vector<12x96xf32> to vector<12x8xf32>
    %111 = arith.addf %107, %110 : vector<12x8xf32>
    %112 = vector.extract_strided_slice %60 {offsets = [0, 88], sizes = [12, 8], strides = [1, 1]} : vector<12x96xf32> to vector<12x8xf32>
    %113 = arith.addf %109, %112 : vector<12x8xf32>
    %114 = vector.extract_strided_slice %65 {offsets = [0, 88], sizes = [12, 8], strides = [1, 1]} : vector<12x96xf32> to vector<12x8xf32>
    %115 = arith.addf %111, %114 : vector<12x8xf32>
    %cst_42 = arith.constant dense<0.000000e+00> : vector<8xf32>
    %116 = vector.multi_reduction <add>, %113, %cst_42 [0] : vector<12x8xf32> to vector<8xf32>
    %117 = vector.shape_cast %116 : vector<8xf32> to vector<1x8xf32>
    %cst_43 = arith.constant dense<0.000000e+00> : vector<8xf32>
    %118 = vector.multi_reduction <add>, %115, %cst_43 [0] : vector<12x8xf32> to vector<8xf32>
    %119 = vector.shape_cast %118 : vector<8xf32> to vector<1x8xf32>
    %120 = tpu.concatenate %117, %119 in 1 : vector<1x8xf32>, vector<1x8xf32> -> vector<1x16xf32>
    %c0_44 = arith.constant 0 : index
    %c0_45 = arith.constant 0 : index
    %c0_46 = arith.constant 0 : index
    %121 = vector.load %arg7[%c0_44, %c0_45, %c0_46] : memref<1x1x16xf32, #tpu.memory_space<vmem>>, vector<1x1x16xf32>
    %122 = vector.shape_cast %121 : vector<1x1x16xf32> to vector<1x16xf32>
    %123 = vector.shape_cast %120 : vector<1x16xf32> to vector<1x1x16xf32>
    tpu.vector_store %arg7[%c0_44, %c0_45, %c0_46], %123 {strides = array<i32>} : memref<1x1x16xf32, #tpu.memory_space<vmem>>, vector<1x1x16xf32>,
    return
  }
  func.func @transform_0(%arg0: i32) -> (i32, i32, i32) {
    %c0_i32 = arith.constant 0 : i32
    %c0_i32_0 = arith.constant 0 : i32
    %c0_i32_1 = arith.constant 0 : i32
    return %arg0, %c0_i32, %c0_i32_0 : i32, i32, i32
  }
  func.func @transform_1(%arg0: i32) -> (i32, i32) {
    %c0_i32 = arith.constant 0 : i32
    %c0_i32_0 = arith.constant 0 : i32
    %c0_i32_1 = arith.constant 0 : i32
    return %c0_i32, %c0_i32_0 : i32, i32
  }
  func.func @transform_2(%arg0: i32) -> (i32, i32) {
    %c0_i32 = arith.constant 0 : i32
    %c0_i32_0 = arith.constant 0 : i32
    %c0_i32_1 = arith.constant 0 : i32
    return %c0_i32, %c0_i32_0 : i32, i32
  }
  func.func @transform_3(%arg0: i32) -> (i32, i32, i32) {
    %c0_i32 = arith.constant 0 : i32
    %c0_i32_0 = arith.constant 0 : i32
    %c0_i32_1 = arith.constant 0 : i32
    %c0_i32_2 = arith.constant 0 : i32
    return %c0_i32, %c0_i32_0, %c0_i32_1 : i32, i32, i32
  }
  func.func @transform_4(%arg0: i32) -> (i32, i32) {
    %c0_i32 = arith.constant 0 : i32
    %c0_i32_0 = arith.constant 0 : i32
    %c0_i32_1 = arith.constant 0 : i32
    return %c0_i32, %c0_i32_0 : i32, i32
  }
  func.func @transform_5(%arg0: i32) -> (i32, i32, i32) {
    %c0_i32 = arith.constant 0 : i32
    %c0_i32_0 = arith.constant 0 : i32
    %c0_i32_1 = arith.constant 0 : i32
    return %arg0, %c0_i32, %c0_i32_0 : i32, i32, i32
  }
  func.func @transform_6(%arg0: i32) -> (i32, i32, i32) {
    %c0_i32 = arith.constant 0 : i32
    %c0_i32_0 = arith.constant 0 : i32
    %c0_i32_1 = arith.constant 0 : i32
    return %arg0, %c0_i32, %c0_i32_0 : i32, i32, i32
  }
}

module attributes {stable_mosaic.version = 11 : i64} {
  func.func @_deconv2x2_kernel(%arg0: i32, %arg1: memref<1x12x96xbf16, #tpu.memory_space<vmem>>, %arg2: memref<1x96xf32, #tpu.memory_space<vmem>>, %arg3: memref<1x96xf32, #tpu.memory_space<vmem>>, %arg4: memref<2x96x96xbf16, #tpu.memory_space<vmem>>, %arg5: memref<1x96xf32, #tpu.memory_space<vmem>>, %arg6: memref<1x2x12x96xf32, #tpu.memory_space<vmem>>) attributes {dimension_semantics = [#tpu.dimension_semantics<parallel>], iteration_bounds = array<i64: 2>, scalar_prefetch = 0 : i64, scratch_operands = 0 : i64, tpu.core_type = #tpu.core_type<tc>, window_params = [{transform_indices = @transform_0, window_bounds = array<i64: 1, 12, 96>}, {pipeline_mode = #tpu.pipeline_mode<synchronous>, transform_indices = @transform_1, window_bounds = array<i64: 1, 96>}, {pipeline_mode = #tpu.pipeline_mode<synchronous>, transform_indices = @transform_2, window_bounds = array<i64: 1, 96>}, {pipeline_mode = #tpu.pipeline_mode<synchronous>, transform_indices = @transform_3, window_bounds = array<i64: 2, 96, 96>}, {pipeline_mode = #tpu.pipeline_mode<synchronous>, transform_indices = @transform_4, window_bounds = array<i64: 1, 96>}, {transform_indices = @transform_5, window_bounds = array<i64: 1, 2, 12, 96>}]} {
    %c0 = arith.constant 0 : index
    %c0_0 = arith.constant 0 : index
    %c0_1 = arith.constant 0 : index
    %0 = vector.load %arg1[%c0, %c0_0, %c0_1] : memref<1x12x96xbf16, #tpu.memory_space<vmem>>, vector<1x12x96xbf16>
    %1 = vector.shape_cast %0 : vector<1x12x96xbf16> to vector<12x96xbf16>
    %2 = arith.extf %1 : vector<12x96xbf16> to vector<12x96xf32>
    %c0_2 = arith.constant 0 : index
    %c0_3 = arith.constant 0 : index
    %3 = vector.load %arg2[%c0_2, %c0_3] : memref<1x96xf32, #tpu.memory_space<vmem>>, vector<1x96xf32>
    %4 = vector.broadcast %3 : vector<1x96xf32> to vector<12x96xf32>
    %5 = arith.mulf %2, %4 : vector<12x96xf32>
    %c0_4 = arith.constant 0 : index
    %c0_5 = arith.constant 0 : index
    %6 = vector.load %arg3[%c0_4, %c0_5] : memref<1x96xf32, #tpu.memory_space<vmem>>, vector<1x96xf32>
    %7 = vector.broadcast %6 : vector<1x96xf32> to vector<12x96xf32>
    %8 = arith.addf %5, %7 : vector<12x96xf32>
    %cst = arith.constant 0.000000e+00 : f32
    %9 = vector.broadcast %cst : f32 to vector<12x96xf32>
    %10 = arith.maximumf %8, %9 : vector<12x96xf32>
    %11 = arith.truncf %10 : vector<12x96xf32> to vector<12x96xbf16>
    %c0_6 = arith.constant 0 : index
    %c0_7 = arith.constant 0 : index
    %c0_8 = arith.constant 0 : index
    %12 = vector.load %arg4[%c0_6, %c0_7, %c0_8] : memref<2x96x96xbf16, #tpu.memory_space<vmem>>, vector<1x96x96xbf16>
    %13 = vector.shape_cast %12 : vector<1x96x96xbf16> to vector<96x96xbf16>
    %cst_9 = arith.constant dense<0.000000e+00> : vector<12x96xf32>
    %14 = tpu.matmul %11, %13, %cst_9 {dimension_numbers = #tpu.dot_dimension_numbers<[1], [0], [0], [1], [0, 0, 1, 1], [], []>} : vector<12x96xbf16>, vector<96x96xbf16>, vector<12x96xf32> -> vector<12x96xf32>
    %c0_10 = arith.constant 0 : index
    %c0_11 = arith.constant 0 : index
    %15 = vector.load %arg5[%c0_10, %c0_11] : memref<1x96xf32, #tpu.memory_space<vmem>>, vector<1x96xf32>
    %16 = vector.broadcast %15 : vector<1x96xf32> to vector<12x96xf32>
    %17 = arith.addf %14, %16 : vector<12x96xf32>
    %c0_12 = arith.constant 0 : index
    %c0_13 = arith.constant 0 : index
    %c0_14 = arith.constant 0 : index
    %c0_15 = arith.constant 0 : index
    %18 = vector.load %arg6[%c0_12, %c0_13, %c0_14, %c0_15] : memref<1x2x12x96xf32, #tpu.memory_space<vmem>>, vector<1x1x12x96xf32>
    %19 = vector.shape_cast %18 : vector<1x1x12x96xf32> to vector<12x96xf32>
    %20 = vector.shape_cast %17 : vector<12x96xf32> to vector<1x1x12x96xf32>
    tpu.vector_store %arg6[%c0_12, %c0_13, %c0_14, %c0_15], %20 {strides = array<i32>} : memref<1x2x12x96xf32, #tpu.memory_space<vmem>>, vector<1x1x12x96xf32>,
    %c1 = arith.constant 1 : index
    %c0_16 = arith.constant 0 : index
    %c0_17 = arith.constant 0 : index
    %21 = vector.load %arg4[%c1, %c0_16, %c0_17] : memref<2x96x96xbf16, #tpu.memory_space<vmem>>, vector<1x96x96xbf16>
    %22 = vector.shape_cast %21 : vector<1x96x96xbf16> to vector<96x96xbf16>
    %cst_18 = arith.constant dense<0.000000e+00> : vector<12x96xf32>
    %23 = tpu.matmul %11, %22, %cst_18 {dimension_numbers = #tpu.dot_dimension_numbers<[1], [0], [0], [1], [0, 0, 1, 1], [], []>} : vector<12x96xbf16>, vector<96x96xbf16>, vector<12x96xf32> -> vector<12x96xf32>
    %c0_19 = arith.constant 0 : index
    %c0_20 = arith.constant 0 : index
    %24 = vector.load %arg5[%c0_19, %c0_20] : memref<1x96xf32, #tpu.memory_space<vmem>>, vector<1x96xf32>
    %25 = vector.broadcast %24 : vector<1x96xf32> to vector<12x96xf32>
    %26 = arith.addf %23, %25 : vector<12x96xf32>
    %c0_21 = arith.constant 0 : index
    %c1_22 = arith.constant 1 : index
    %c0_23 = arith.constant 0 : index
    %c0_24 = arith.constant 0 : index
    %27 = vector.load %arg6[%c0_21, %c1_22, %c0_23, %c0_24] : memref<1x2x12x96xf32, #tpu.memory_space<vmem>>, vector<1x1x12x96xf32>
    %28 = vector.shape_cast %27 : vector<1x1x12x96xf32> to vector<12x96xf32>
    %29 = vector.shape_cast %26 : vector<12x96xf32> to vector<1x1x12x96xf32>
    tpu.vector_store %arg6[%c0_21, %c1_22, %c0_23, %c0_24], %29 {strides = array<i32>} : memref<1x2x12x96xf32, #tpu.memory_space<vmem>>, vector<1x1x12x96xf32>,
    return
  }
  func.func @transform_0(%arg0: i32) -> (i32, i32, i32) {
    %c0_i32 = arith.constant 0 : i32
    %c0_i32_0 = arith.constant 0 : i32
    %c0_i32_1 = arith.constant 0 : i32
    return %arg0, %c0_i32, %c0_i32_0 : i32, i32, i32
  }
  func.func @transform_1(%arg0: i32) -> (i32, i32) {
    %c0_i32 = arith.constant 0 : i32
    %c0_i32_0 = arith.constant 0 : i32
    %c0_i32_1 = arith.constant 0 : i32
    return %c0_i32, %c0_i32_0 : i32, i32
  }
  func.func @transform_2(%arg0: i32) -> (i32, i32) {
    %c0_i32 = arith.constant 0 : i32
    %c0_i32_0 = arith.constant 0 : i32
    %c0_i32_1 = arith.constant 0 : i32
    return %c0_i32, %c0_i32_0 : i32, i32
  }
  func.func @transform_3(%arg0: i32) -> (i32, i32, i32) {
    %c0_i32 = arith.constant 0 : i32
    %c0_i32_0 = arith.constant 0 : i32
    %c0_i32_1 = arith.constant 0 : i32
    %c0_i32_2 = arith.constant 0 : i32
    return %c0_i32, %c0_i32_0, %c0_i32_1 : i32, i32, i32
  }
  func.func @transform_4(%arg0: i32) -> (i32, i32) {
    %c0_i32 = arith.constant 0 : i32
    %c0_i32_0 = arith.constant 0 : i32
    %c0_i32_1 = arith.constant 0 : i32
    return %c0_i32, %c0_i32_0 : i32, i32
  }
  func.func @transform_5(%arg0: i32) -> (i32, i32, i32, i32) {
    %c0_i32 = arith.constant 0 : i32
    %c0_i32_0 = arith.constant 0 : i32
    %c0_i32_1 = arith.constant 0 : i32
    %c0_i32_2 = arith.constant 0 : i32
    return %arg0, %c0_i32, %c0_i32_0, %c0_i32_1 : i32, i32, i32, i32
  }
}

</mosaic_0001>

<bundles_post_ra>
// kernel: tile.34
= control target key start
LH: loop header
LB: loop body
LE: loop exit
PB: predicated region body
PF: predicated region fallthrough
CT: control target
= control target key end

     0   :  { %s28_s0 = inlined_call_operand.vmem [shape: f32[8], index: 0, kind: input, shape index: {}]   ;;  %s29_s1 = inlined_call_operand.vmem [shape: f32[14,8], index: 1, kind: output, shape index: {}]  }
   0x1   :  { %v4_v0 = vld [vmem:[%s28_s0] ss:$0 sm:$0xff] }
   0x2   :  { %5 = vst [vmem:[%s29_s1] sm:$0xff] %v4_v0 }
   0x3   :  { %8 = vst [vmem:[%s29_s1 + $0x8] sm:$0xff] %v4_v0 }

// kernel: tile.35
= control target key start
LH: loop header
LB: loop body
LE: loop exit
PB: predicated region body
PF: predicated region fallthrough
CT: control target
= control target key end

     0   :  { %s115_s10 = smov 104   ;;  %s116_s11 = smov 88   ;;  %vm3_vm0 = vcmask 64512   ;;  %vm9_vm1 = vcmask 917312   ;;  %vm15_vm2 = vcmask 851712   ;;  %vm21_vm3 = vcmask 786112   ;;  %s183_s0 = inlined_call_operand.vmem [shape: f32[14,8], index: 0, kind: input, shape index: {}]   ;;  %s184_s1 = inlined_call_operand.vmem [shape: f32[1,112], index: 1, kind: output, shape index: {}]  }
   0x1   :  { %v89_v0 = vld [vmem:[%s183_s0 + $0xd] sm:$0x1]   ;;  %v91_v1 = vld [vmem:[%s183_s0 + $0xb] sm:$0x1]   ;;  %v93_v2 = vld [vmem:[%s183_s0 + $0x9] sm:$0x1]  }
   0x2   :  { %7 = vrot.lane.b32.xlu0 %v89_v0, %s115_s10  ;;  %19 = vrot.lane.b32.xlu1 %v91_v1, %s116_s11  ;;  %s117_s14 = smov 72   ;;  %v90_v3 = vld [vmem:[%s183_s0 + $0xc] sm:$0x1]   ;;  %v92_v4 = vld [vmem:[%s183_s0 + $0xa] sm:$0x1]   ;;  %s118_s19 = smov 96  }
   0x3   :  { %31 = vrot.lane.b32.xlu2 %v93_v2, %s117_s14  ;;  %s119_s20 = smov 80   ;;  %v94_v5 = vld [vmem:[%s183_s0 + $0x8] sm:$0x1]   ;;  %s120_s23 = smov 64   ;;  %v95_v6 = vld [vmem:[%s183_s0 + $0x7] sm:$0x1]  }
   0x4   :  { %v96_v7 = vld [vmem:[%s183_s0 + $0x6] sm:$0x1]   ;;  %s121_s28 = smov 56   ;;  %s122_s29 = smov 48   ;;  %v97_v8 = vld [vmem:[%s183_s0 + $0x5] sm:$0x1]  }
   0x5   :  { %s123_s3 = smov 40   ;;  %v98_v9 = vld [vmem:[%s183_s0 + $0x4] sm:$0x1]   ;;  %v99_v10 = vld [vmem:[%s183_s0 + $0x3] sm:$0x1]   ;;  %s124_s8 = smov 32  }
   0x6   :  { %s125_s9 = smov 24   ;;  %v100_v11 = vld [vmem:[%s183_s0 + $0x2] sm:$0x1]   ;;  %s126_s12 = smov 16   ;;  %v101_v12 = vld [vmem:[%s183_s0 + $0x1] sm:$0x1]  }
   0x7   :  { %s127_s15 = smov 8   ;;  %v2_v13 = vld [vmem:[%s183_s0] sm:$0x1]   ;;  %vm27_vm4 = vcmask 720512   ;;  %vm33_vm5 = vcmask 654912   ;;  %vm39_vm6 = vcmask 589312  }
   0x8   :  { %4 = vst.msk [vmem:[#allocation0] sm:$0x1] %vm3_vm0, %v2_v13   ;;  %vm45_vm7 = vcmask 523712   ;;  %vm51_vm8 = vcmask 458112   ;;  %vm57_vm9 = vcmask 392512   ;;  %vm63_vm10 = vcmask 326912  }
   0x9   :  { %vm69_vm11 = vcmask 261312   ;;  %vm75_vm12 = vcmask 195712   ;;  %vm81_vm13 = vcmask 130112  }
   0xa   :  { %13 = vrot.lane.b32.xlu0 %v90_v3, %s118_s19  ;;  %25 = vrot.lane.b32.xlu1 %v92_v4, %s119_s20 }
   0xb   :  { %37 = vrot.lane.b32.xlu2 %v94_v5, %s120_s23 }
  0x12   :  { %43 = vrot.lane.b32.xlu0 %v95_v6, %s121_s28  ;;  %49 = vrot.lane.b32.xlu1 %v96_v7, %s122_s29 }
  0x13   :  { %55 = vrot.lane.b32.xlu2 %v97_v8, %s123_s3 }
  0x1a   :  { %61 = vrot.lane.b32.xlu0 %v98_v9, %s124_s8  ;;  %67 = vrot.lane.b32.xlu1 %v99_v10, %s125_s9 }
  0x1b   :  { %73 = vrot.lane.b32.xlu2 %v100_v11, %s126_s12 }
  0x22   :  { %79 = vrot.lane.b32.xlu0 %v101_v12, %s127_s15 }
  0x5d   :  { %v32_v14 = vpop.permute.xlu2 %31  }
  0x65   :  { %v38_v15 = vpop.permute.xlu2 %37  }
  0x6d   :  { %v56_v16 = vpop.permute.xlu2 %55  }
  0x74   :  { %v8_v17 = vpop.permute.xlu0 %7   ;;  %v20_v18 = vpop.permute.xlu1 %19  }
  0x75   :  { %10 = vst.msk [vmem:[#allocation0] sm:$0x1] %vm9_vm1, %v8_v17   ;;  %v74_v19 = vpop.permute.xlu2 %73  }
  0x7c   :  { %v14_v20 = vpop.permute.xlu0 %13   ;;  %v26_v21 = vpop.permute.xlu1 %25  }
  0x7d   :  { %16 = vst.msk [vmem:[#allocation0] sm:$0x1] %vm15_vm2, %v14_v20  }
  0x7e   :  { %22 = vst.msk [vmem:[#allocation0] sm:$0x1] %vm21_vm3, %v20_v18  }
  0x7f   :  { %28 = vst.msk [vmem:[#allocation0] sm:$0x1] %vm27_vm4, %v26_v21  }
  0x80   :  { %34 = vst.msk [vmem:[#allocation0] sm:$0x1] %vm33_vm5, %v32_v14  }
  0x81   :  { %40 = vst.msk [vmem:[#allocation0] sm:$0x1] %vm39_vm6, %v38_v15  }
  0x84   :  { %v44_v22 = vpop.permute.xlu0 %43   ;;  %v50_v23 = vpop.permute.xlu1 %49  }
  0x85   :  { %46 = vst.msk [vmem:[#allocation0] sm:$0x1] %vm45_vm7, %v44_v22  }
  0x86   :  { %52 = vst.msk [vmem:[#allocation0] sm:$0x1] %vm51_vm8, %v50_v23  }
  0x87   :  { %58 = vst.msk [vmem:[#allocation0] sm:$0x1] %vm57_vm9, %v56_v16  }
  0x8c   :  { %v62_v24 = vpop.permute.xlu0 %61   ;;  %v68_v25 = vpop.permute.xlu1 %67  }
  0x8d   :  { %64 = vst.msk [vmem:[#allocation0] sm:$0x1] %vm63_vm10, %v62_v24  }
  0x8e   :  { %70 = vst.msk [vmem:[#allocation0] sm:$0x1] %vm69_vm11, %v68_v25  }
  0x8f   :  { %76 = vst.msk [vmem:[#allocation0] sm:$0x1] %vm75_vm12, %v74_v19  }
  0x94   :  { %v80_v26 = vpop.permute.xlu0 %79  }
  0x95   :  { %82 = vst.msk [vmem:[#allocation0] sm:$0x1] %vm81_vm13, %v80_v26  }
  0x9c   :  { %v85_v27 = vld [vmem:[#allocation0] sm:$0x1] }
  0x9d   :  { %88 = vst [vmem:[%s184_s1] sm:$0x1] %v85_v27 }

// kernel: decoder_block_forward.3
= control target key start
LH: loop header
LB: loop body
LE: loop exit
PB: predicated region body
PF: predicated region fallthrough
CT: control target
= control target key end

     0   :  { %s1314_s15 = smov 0   ;;  %s1605_s0 = inlined_call_operand.vmem [shape: f32[2,16,64], index: 0, kind: input, shape index: {}]   ;;  %s1606_s1 = inlined_call_operand.vmem [shape: bf16[9,56,112], index: 1, kind: input, shape index: {}]   ;;  %s1607_s2 = inlined_call_operand.vmem [shape: f32[1,112], index: 2, kind: input, shape index: {}]   ;;  %s1608_s3 = inlined_call_operand.vmem [shape: bf16[2,14,112], index: 3, kind: output, shape index: {0}]   ;;  %s1609_s4 = inlined_call_operand.vmem [shape: f32[2,1,16], index: 4, kind: output, shape index: {1}]  }
   0x1 LB: > { %s1029_s16 = sadd.s32 4294967295, %s1272_s15   ;;  %p1033_p0 = scmp.ge.s32.totalorder %s1272_s15, 1  ;;  %s1272_s15 = sphi %s1314_s15, %s15_s15  }
   0x2   : > { %p165_p1 = scmp.lt.s32.totalorder %s1272_s15, 3 }
   0x4   : > { %p166_p2 = pnand %p1033_p0, %p165_p1 }
   0x5   : > { %p194_p3 = scmp.lt.s32.totalorder (!%p166_p2), %s1029_s16, 1  ;;  %s1274_s19 = smov (!%p166_p2), 124  }
   0x6   : > { %169 = sbr.rel (%p166_p2) target bundleno = 648 (0x288), region = 32  ;;  %s1275_s26 = smov (!%p166_p2), 120  }
   0x7   : > { %s1276_s5 = smov (!%p166_p2), 104   ;;  %s1277_s6 = smov (!%p166_p2), 112  }
   0x8   : > { %s1278_s7 = smov (!%p166_p2), 88   ;;  %s1279_s8 = smov (!%p166_p2), 96  }
   0x9   : > { %s1280_s9 = smov (!%p166_p2), 72   ;;  %s1281_s10 = smov (!%p166_p2), 80  }
   0xa   : > { %s1282_s11 = smov (!%p166_p2), 64   ;;  %s1283_s12 = smov (!%p166_p2), 48  }
   0xb   : > { %v1044_v0 = vld [vmem:[%s1606_s1 + $0x34] sm:$0xf]  ;;  %v218_v2 = vld [vmem:[%s1606_s1 + $0x18] sm:$0xf]  ;;  %v1097_v3 = vld [vmem:[%s1606_s1 + $0x6c] sm:$0xf] }
   0xc   : > { %v247_v1 = vunpack.c.l.b16 %v1044_v0  ;;  %s1611_s16 = smov (!%p194_p3, %s1029_s16), 1  ;;  %vm259_vm0 = vcmask 1043456   ;;  %v290_v4 = vunpack.c.l.b16 %v218_v2  ;;  %v398_v5 = vunpack.c.l.b16 %v1097_v3  ;;  %v1077_v7 = vld [vmem:[%s1606_s1 + $0x50] sm:$0xf]  ;;  %v1226_v21 = vld [vmem:[%s1606_s1 + $0x64] sm:$0xff]  ;;  %v1225_v29 = vld [vmem:[%s1606_s1 + $0x5c] sm:$0xff] }
   0xd   : > { %s1213_s25 = sshll.u32 %s1611_s16, 4  ;;  %v341_v10 = vunpack.c.l.b16 %v1077_v7  ;;  %v1220_v16 = vld [vmem:[%s1606_s1 + $0x2c] sm:$0xff]  ;;  %v1219_v26 = vld [vmem:[%s1606_s1 + $0x24] sm:$0xff]  ;;  %v1218_v32 = vld [vmem:[%s1606_s1 + $0x1c] sm:$0xff]  ;;  %vm255_vm1 = vcmask 457728   ;;  %s1214_s27 = sshll.u32 %s1611_s16, 3 }
   0xe   : > { %v251_v6 = vpack.c.b16 %v247_v1, %v247_v1  ;;  %v294_v8 = vpack.c.b16 %v290_v4, %v290_v4  ;;  %v402_v9 = vpack.c.b16 %v398_v5, %v398_v5  ;;  %s198_s28 = scalar_lea.vmem %s1605_s0, %s1213_s25  ;;  %v1217_v20 = vld [vmem:[%s1606_s1 + $0x10] sm:$0xff]  ;;  %v1223_v25 = vld [vmem:[%s1606_s1 + $0x48] sm:$0xff]  ;;  %v1215_v34 = vld [vmem:[%s1606_s1] sm:$0xff]  ;;  %s203_s30 = scalar_lea.vmem %s1608_s3, %s1214_s27  ;;  %vm700_vm2 = vcmask 912384  }
   0xf   : > { %v208_v12 = vld [vmem:[%s198_s28] sm:$0xff]  ;;  %v209_v13 = vld [vmem:[%s198_s28 + $0x8] sm:$0xff]  ;;  %v345_v17 = vpack.c.b16 %v341_v10, %v341_v10  ;;  %v1224_v35 = vld [vmem:[%s1606_s1 + $0x54] sm:$0xff]  ;;  %vm702_vm3 = vcmask 911360   ;;  %s1284_s13 = smov 56   ;;  %s1285_s14 = smov 40  }
  0x10   : > { %v261_v11 = vsel %vm259_vm0, %v251_v6, 0  ;;  %v302_v14 = vsel %vm259_vm0, %v294_v8, 0  ;;  %v410_v15 = vsel %vm259_vm0, %v402_v9, 0  ;;  %v210_v18 = vpack.c.bf16 %v208_v12, %v208_v12  ;;  %v1216_v28 = vld [vmem:[%s1606_s1 + $0x8] sm:$0xff]  ;;  %v1137_v40 = vld [vmem:[%s1606_s1 + $0xa4] sm:$0xf]  ;;  %s206_s21 = scalar_lea.vmem %s1609_s4, %s1611_s16 }
  0x11   : > { %267 = vmatpush.bf16.msra.mxu0 %v261_v11  ;;  %v211_v19 = vpack.c.bf16 %v209_v13, %v209_v13  ;;  %308 = vmatpush.bf16.msra.mxu1 %v302_v14  ;;  %v353_v22 = vsel %vm259_vm0, %v345_v17, 0  ;;  %v1117_v38 = vld [vmem:[%s1606_s1 + $0x88] sm:$0xf]  ;;  %v1177_v41 = vld [vmem:[%s1606_s1 + $0xdc] sm:$0xf]  ;;  %v504_v43 = vunpack.c.l.b16 %v1137_v40  ;;  %v1222_v45 = vld [vmem:[%s1606_s1 + $0x40] sm:$0xff] }
  0x12   : > { %416 = vmatpush.bf16.msra.mxu3 %v410_v15  ;;  %v229_v23 = vunpack.c.l.b16 %v210_v18  ;;  %359 = vmatpush.bf16.msra.mxu2 %v353_v22  ;;  %v451_v39 = vunpack.c.l.b16 %v1117_v38  ;;  %v609_v44 = vunpack.c.l.b16 %v1177_v41  ;;  %v1221_v49 = vld [vmem:[%s1606_s1 + $0x38] sm:$0xff]  ;;  %v1229_v50 = vld [vmem:[%s1606_s1 + $0x80] sm:$0xff]  ;;  %v1237_v61 = vld [vmem:[%s1606_s1 + $0xcc] sm:$0xff]  ;;  %s1286_s17 = smov 24   ;;  %s1287_s18 = smov 32   ;;  %vm922_vm4 = vcmask 64512  }
  0x13   : > { %v230_v24 = vunpack.c.l.b16 %v211_v19  ;;  %v508_v47 = vpack.c.b16 %v504_v43, %v504_v43  ;;  %v1232_v53 = vld [vmem:[%s1606_s1 + $0x9c] sm:$0xff]  ;;  %v1238_v54 = vld [vmem:[%s1606_s1 + $0xd4] sm:$0xff]  ;;  %v1230_v0 = vld [vmem:[%s1606_s1 + $0x8c] sm:$0xff]  ;;  %vm924_vm5 = vcmask 62464   ;;  %vm947_vm6 = vcmask 122880  }
  0x14   : > { %v455_v42 = vpack.c.b16 %v451_v39, %v451_v39  ;;  %v613_v48 = vpack.c.b16 %v609_v44, %v609_v44  ;;  %v1157_v55 = vld [vmem:[%s1606_s1 + $0xc0] sm:$0xf]  ;;  %v1228_v58 = vld [vmem:[%s1606_s1 + $0x78] sm:$0xff]  ;;  %v1227_v63 = vld [vmem:[%s1606_s1 + $0x70] sm:$0xff] }
  0x15   : > { %268 = vmatpush.bf16.msra.mxu0 %v1220_v16  ;;  %v231_v27 = vpack.c.b16 %v230_v24, %v229_v23  ;;  %309 = vmatpush.bf16.msra.mxu1 %v1217_v20  ;;  %v516_v51 = vsel %vm259_vm0, %v508_v47, 0  ;;  %v556_v56 = vunpack.c.l.b16 %v1157_v55  ;;  %v1231_v60 = vld [vmem:[%s1606_s1 + $0x94] sm:$0xff]  ;;  %v1236_v1 = vld [vmem:[%s1606_s1 + $0xc4] sm:$0xff] }
  0x16   : > { %417 = vmatpush.bf16.msra.mxu3 %v1226_v21  ;;  %360 = vmatpush.bf16.msra.mxu2 %v1223_v25  ;;  %v463_v46 = vsel %vm259_vm0, %v455_v42, 0  ;;  %v621_v52 = vsel %vm259_vm0, %v613_v48, 0  ;;  %v1235_v62 = vld [vmem:[%s1606_s1 + $0xb8] sm:$0xff]  ;;  %v1234_v2 = vld [vmem:[%s1606_s1 + $0xb0] sm:$0xff]  ;;  %v1233_v4 = vld [vmem:[%s1606_s1 + $0xa8] sm:$0xff] }
  0x17   : > { %232 = vrot.lane.b32.xlu0 %v231_v27, %s1274_s19  ;;  %v379_v30 = vshrl.u32 %v231_v27, 16  ;;  %v381_v31 = vshll.u32 %v231_v27, 16  ;;  %v1376_v37 = vrot.slane %v231_v27, 1  ;;  %v560_v57 = vpack.c.b16 %v556_v56, %v556_v56  ;;  %v1197_v5 = vld [vmem:[%s1606_s1 + $0xf8] sm:$0xf]  ;;  %v1241_v10 = vld [vmem:[%s1606_s1 + $0xf0] sm:$0xff] }
  0x18   : > { %v662_v6 = vunpack.c.l.b16 %v1197_v5  ;;  %v1240_v12 = vld [vmem:[%s1606_s1 + $0xe8] sm:$0xff]  ;;  %v1239_v14 = vld [vmem:[%s1606_s1 + $0xe0] sm:$0xff] }
  0x19   : > { %269 = vmatpush.bf16.msra.mxu0 %v1219_v26  ;;  %v383_v33 = vrot.slane %v381_v31, 1  ;;  %310 = vmatpush.bf16.msra.mxu1 %v1216_v28  ;;  %v568_v59 = vsel %vm259_vm0, %v560_v57, 0  ;;  %v1265_v42 = vld [vmem:[%s1607_s2] ss:$0 sm:$0xff] }
  0x1a   : > { %418 = vmatpush.bf16.msra.mxu3 %v1225_v29  ;;  %361 = vmatpush.bf16.msra.mxu2 %v1222_v45  ;;  %v666_v7 = vpack.c.b16 %v662_v6, %v662_v6 }
  0x1b   : > { %v384_v36 = vor.u32 %v383_v33, %v379_v30 }
  0x1c   : > { %v674_v8 = vsel %vm259_vm0, %v666_v7, 0 }
  0x1d   : > { %270 = vmatpush.bf16.msra.mxu0 %v1218_v32  ;;  %436 = vrot.lane.b32.xlu1 %v384_v36, %s1274_s19 }
  0x1e   : > { %489 = vrot.lane.b32.xlu2 %v384_v36, %s1275_s26  ;;  %311 = vmatpush.bf16.msra.mxu1 %v1215_v34 }
  0x1f   : > { %419 = vmatpush.bf16.msra.mxu3 %v1224_v35  ;;  %326 = vrot.lane.b32.xlu0 %v231_v27, %s1275_s26 }
  0x20   : > { %362 = vmatpush.bf16.msra.mxu2 %v1221_v49 }
  0x21   : > { %1070 = vmatmul.msk.bf16.vlgmr.msra.gmra.mxu1 %vm255_vm1, %v231_v27  ;;  %469 = vmatpush.bf16.msrb.mxu0 %v463_v46 }
  0x22   : > { %1110 = vmatmul.msk.bf16.vlgmr.msra.gmra.mxu3 %vm255_vm1, %v384_v36  ;;  %522 = vmatpush.bf16.msrb.mxu1 %v516_v51 }
  0x23   : > { %627 = vmatpush.bf16.msrb.mxu3 %v621_v52 }
  0x24   : > { %574 = vmatpush.bf16.msrb.mxu2 %v568_v59 }
  0x25   : > { %594 = vrot.lane.b32.xlu1 %v1376_v37, %s1274_s19  ;;  %470 = vmatpush.bf16.msrb.mxu0 %v1229_v50 }
  0x26   : > { %647 = vrot.lane.b32.xlu2 %v1376_v37, %s1275_s26  ;;  %523 = vmatpush.bf16.msrb.mxu1 %v1232_v53 }
  0x27   : > { %628 = vmatpush.bf16.msrb.mxu3 %v1238_v54 }
  0x28   : > { %575 = vmatpush.bf16.msrb.mxu2 %v1235_v62 }
  0x29   : > { %471 = vmatpush.bf16.msrb.mxu0 %v1228_v58 }
  0x2a   : > { %524 = vmatpush.bf16.msrb.mxu1 %v1231_v60 }
  0x2b   : > { %629 = vmatpush.bf16.msrb.mxu3 %v1237_v61 }
  0x2c   : > { %576 = vmatpush.bf16.msrb.mxu2 %v1234_v2 }
  0x2d   : > { %472 = vmatpush.bf16.msrb.mxu0 %v1227_v63 }
  0x2e   : > { %525 = vmatpush.bf16.msrb.mxu1 %v1230_v0 }
  0x2f   : > { %630 = vmatpush.bf16.msrb.mxu3 %v1236_v1 }
  0x30   : > { %577 = vmatpush.bf16.msrb.mxu2 %v1233_v4 }
  0x78   : > { %v490_v3 = vpop.permute.xlu2 %489 }
  0x79   : > { %1150 = vmatmul.msk.bf16.vlgmr.msrb.gmra.mxu1 %vm255_vm1, %v490_v3 }
  0x80   : > { %v648_v16 = vpop.permute.xlu2 %647 }
  0x89   : > { %v233_v9 = vpop.permute.xlu0 %232 }
  0x8a   : > { %1057 = vmatmul.msk.bf16.vlgmr.msra.gmra.mxu0 %vm255_vm1, %v233_v9 }
  0x8b   : > { %680 = vmatpush.bf16.msra.mxu0 %v674_v8 }
  0x8f   : > { %v437_v11 = vpop.permute.xlu1 %436  ;;  %681 = vmatpush.bf16.msra.mxu0 %v1241_v10 }
  0x91   : > { %v327_v13 = vpop.permute.xlu0 %326 }
  0x92   : > { %1090 = vmatmul.msk.bf16.vlgmr.msra.gmra.mxu2 %vm255_vm1, %v327_v13 }
  0x93   : > { %682 = vmatpush.bf16.msra.mxu0 %v1240_v12 }
  0x97   : > { %v595_v15 = vpop.permute.xlu1 %594  ;;  %683 = vmatpush.bf16.msra.mxu0 %v1239_v14 }
  0x98   : > { %1190 = vmatmul.msk.bf16.vlgmr.msrb.gmra.mxu3 %vm255_vm1, %v595_v15 }
  0x9a   : > { %1130 = vmatmul.msk.bf16.vlgmr.msrb.gmra.mxu0 %vm255_vm1, %v437_v11 }
  0x9e   : > { %v313_v18 = vpop.f32.mrf.mxu1 }
  0xa2   : > { %1170 = vmatmul.msk.bf16.vlgmr.msrb.gmra.mxu2 %vm255_vm1, %v1376_v37 }
  0xa5   : > { %v421_v20 = vpop.f32.mrf.mxu3 }
  0xa6   : > { %v315_v25 = vpop.f32.mrf.mxu1 }
  0xaa   : > { %1210 = vmatmul.msk.bf16.vlgmr.msra.gmra.mxu0 %vm255_vm1, %v648_v16 }
  0xad   : > { %v423_v26 = vpop.f32.mrf.mxu3 }
  0xf6   : > { %v527_v33 = vpop.f32.mrf.mxu1 }
  0xfe   : > { %v529_v44 = vpop.f32.mrf.mxu1 }
 0x107   : > { %v272_v17 = vpop.f32.mrf.mxu0 }
 0x108   : > { %v314_v22 = vadd.f32 %v313_v18, %v272_v17 }
 0x10f   : > { %v274_v19 = vpop.f32.mrf.mxu0 }
 0x110   : > { %v316_v29 = vadd.f32 %v315_v25, %v274_v19 }
 0x115   : > { %v364_v21 = vpop.f32.mrf.mxu2 }
 0x116   : > { %v369_v24 = vadd.f32 %v364_v21, %v314_v22 }
 0x117   : > { %v474_v23 = vpop.f32.mrf.mxu0 }
 0x118   : > { %v426_v27 = vadd.f32 %v421_v20, %v369_v24 }
 0x11a   : > { %v479_v31 = vadd.f32 %v474_v23, %v426_v27 }
 0x11b   : > { %v632_v36 = vpop.f32.mrf.mxu3 }
 0x11c   : > { %v532_v34 = vadd.f32 %v527_v33, %v479_v31 }
 0x11d   : > { %v366_v28 = vpop.f32.mrf.mxu2 }
 0x11e   : > { %v370_v32 = vadd.f32 %v366_v28, %v316_v29 }
 0x11f   : > { %v476_v30 = vpop.f32.mrf.mxu0 }
 0x120   : > { %v427_v35 = vadd.f32 %v423_v26, %v370_v32 }
 0x122   : > { %v480_v40 = vadd.f32 %v476_v30, %v427_v35 }
 0x123   : > { %v634_v50 = vpop.f32.mrf.mxu3 }
 0x124   : > { %v533_v45 = vadd.f32 %v529_v44, %v480_v40 }
 0x125   : > { %v579_v37 = vpop.f32.mrf.mxu2 }
 0x126   : > { %v584_v38 = vadd.f32 %v579_v37, %v532_v34 }
 0x127   : > { %v685_v39 = vpop.f32.mrf.mxu0 }
 0x128   : > { %v637_v41 = vadd.f32 %v632_v36, %v584_v38 }
 0x12a   : > { %v690_v43 = vadd.f32 %v685_v39, %v637_v41 }
 0x12c   : > { %v1466_v46 = vadd.f32 %v1265_v42, %v690_v43 }
 0x12d   : > { %v581_v47 = vpop.f32.mrf.mxu2 }
 0x12e   : > { %v698_v48 = vpack.c.bf16 %v1466_v46, %v1466_v46  ;;  %v585_v49 = vadd.f32 %v581_v47, %v533_v45  ;;  %746 = vrot.lane.b32.xlu2 %v1466_v46, %s1276_s5  ;;  %730 = vrot.lane.b32.xlu1 %v1466_v46, %s1277_s6  ;;  %v1483_v55 = vmul.f32 %v1466_v46, %v1466_v46 }
 0x12f   : > { %712 = vrot.lane.b32.xlu0 %v1466_v46, %s1275_s26  ;;  %v687_v52 = vpop.f32.mrf.mxu0 }
 0x130   : > { %701 = vst.msk [vmem:[%s203_s30] sm:$0xf] %vm700_vm2, %v698_v48  ;;  %v638_v51 = vadd.f32 %v634_v50, %v585_v49 }
 0x132   : > { %v691_v53 = vadd.f32 %v687_v52, %v638_v51 }
 0x134   : > { %v1479_v54 = vadd.f32 %v1265_v42, %v691_v53 }
 0x136   : > { %v699_v56 = vpack.c.bf16 %v1479_v54, %v1479_v54  ;;  %778 = vrot.lane.b32.xlu1 %v1466_v46, %s1278_s7  ;;  %722 = vrot.lane.b32.xlu2 %v1483_v55, %s1275_s26  ;;  %v1525_v57 = vmul.f32 %v1479_v54, %v1479_v54 }
 0x137   : > { %762 = vrot.lane.b32.xlu0 %v1466_v46, %s1279_s8 }
 0x138   : > { %703 = vst.msk [vmem:[%s203_s30 + $0x4] sm:$0x7] %vm702_vm3, %v699_v56 }
 0x13e   : > { %754 = vrot.lane.b32.xlu1 %v1483_v55, %s1276_s5  ;;  %770 = vrot.lane.b32.xlu2 %v1483_v55, %s1279_s8 }
 0x13f   : > { %738 = vrot.lane.b32.xlu0 %v1483_v55, %s1277_s6 }
 0x146   : > { %786 = vrot.lane.b32.xlu1 %v1483_v55, %s1278_s7  ;;  %818 = vrot.lane.b32.xlu2 %v1483_v55, %s1280_s9 }
 0x147   : > { %802 = vrot.lane.b32.xlu0 %v1483_v55, %s1281_s10 }
 0x14e   : > { %834 = vrot.lane.b32.xlu1 %v1483_v55, %s1282_s11  ;;  %866 = vrot.lane.b32.xlu2 %v1483_v55, %s1283_s12 }
 0x14f   : > { %850 = vrot.lane.b32.xlu0 %v1483_v55, %s1284_s13 }
 0x156   : > { %882 = vrot.lane.b32.xlu1 %v1483_v55, %s1285_s14  ;;  %914 = vrot.lane.b32.xlu2 %v1483_v55, %s1286_s17 }
 0x157   : > { %898 = vrot.lane.b32.xlu0 %v1483_v55, %s1287_s18 }
 0x15e   : > { %714 = vrot.lane.b32.xlu1 %v1479_v54, %s1275_s26  ;;  %732 = vrot.lane.b32.xlu2 %v1479_v54, %s1277_s6 }
 0x15f   : > { %748 = vrot.lane.b32.xlu0 %v1479_v54, %s1276_s5 }
 0x166   : > { %764 = vrot.lane.b32.xlu1 %v1479_v54, %s1279_s8  ;;  %756 = vrot.lane.b32.xlu2 %v1525_v57, %s1276_s5 }
 0x167   : > { %724 = vrot.lane.b32.xlu0 %v1525_v57, %s1275_s26  ;;  %s1288_s26 = smov 8  }
 0x16e   : > { %740 = vrot.lane.b32.xlu1 %v1525_v57, %s1277_s6  ;;  %788 = vrot.lane.b32.xlu2 %v1525_v57, %s1278_s7 }
 0x16f   : > { %772 = vrot.lane.b32.xlu0 %v1525_v57, %s1279_s8 }
 0x176   : > { %804 = vrot.lane.b32.xlu1 %v1525_v57, %s1281_s10  ;;  %836 = vrot.lane.b32.xlu2 %v1525_v57, %s1282_s11 }
 0x177   : > { %820 = vrot.lane.b32.xlu0 %v1525_v57, %s1280_s9 }
 0x17e   : > { %852 = vrot.lane.b32.xlu1 %v1525_v57, %s1284_s13  ;;  %884 = vrot.lane.b32.xlu2 %v1525_v57, %s1285_s14 }
 0x17f   : > { %868 = vrot.lane.b32.xlu0 %v1525_v57, %s1283_s12 }
 0x186   : > { %900 = vrot.lane.b32.xlu1 %v1525_v57, %s1287_s18  ;;  %780 = vrot.lane.b32.xlu2 %v1479_v54, %s1278_s7 }
 0x187   : > { %794 = vrot.lane.b32.xlu0 %v1466_v46, %s1281_s10 }
 0x188   : > { %v747_v58 = vpop.permute.xlu2 %746 }
 0x18e   : > { %796 = vrot.lane.b32.xlu1 %v1479_v54, %s1281_s10  ;;  %810 = vrot.lane.b32.xlu2 %v1466_v46, %s1280_s9 }
 0x18f   : > { %916 = vrot.lane.b32.xlu0 %v1525_v57, %s1286_s17 }
 0x190   : > { %v723_v59 = vpop.permute.xlu2 %722 }
 0x191   : > { %v728_v25 = vadd.f32 %v723_v59, %v1483_v55 }
 0x196   : > { %826 = vrot.lane.b32.xlu1 %v1466_v46, %s1282_s11  ;;  %828 = vrot.lane.b32.xlu2 %v1479_v54, %s1282_s11 }
 0x197   : > { %812 = vrot.lane.b32.xlu0 %v1479_v54, %s1280_s9 }
 0x198   : > { %v771_v60 = vpop.permute.xlu2 %770 }
 0x19e   : > { %844 = vrot.lane.b32.xlu1 %v1479_v54, %s1284_s13  ;;  %858 = vrot.lane.b32.xlu2 %v1466_v46, %s1283_s12 }
 0x19f   : > { %842 = vrot.lane.b32.xlu0 %v1466_v46, %s1284_s13 }
 0x1a0   : > { %v731_v61 = vpop.permute.xlu1 %730  ;;  %v819_v1 = vpop.permute.xlu2 %818 }
 0x1a1   : > { %v713_v62 = vpop.permute.xlu0 %712 }
 0x1a2   : > { %v718_v63 = vadd.f32 %v713_v62, %v1466_v46 }
 0x1a4   : > { %v736_v0 = vadd.f32 %v731_v61, %v718_v63 }
 0x1a6   : > { %874 = vrot.lane.b32.xlu1 %v1466_v46, %s1285_s14  ;;  %876 = vrot.lane.b32.xlu2 %v1479_v54, %s1285_s14  ;;  %v752_v2 = vadd.f32 %v747_v58, %v736_v0 }
 0x1a7   : > { %860 = vrot.lane.b32.xlu0 %v1479_v54, %s1283_s12 }
 0x1a8   : > { %v779_v3 = vpop.permute.xlu1 %778  ;;  %v867_v7 = vpop.permute.xlu2 %866 }
 0x1a9   : > { %v763_v4 = vpop.permute.xlu0 %762 }
 0x1aa   : > { %v768_v5 = vadd.f32 %v763_v4, %v752_v2 }
 0x1ac   : > { %v784_v6 = vadd.f32 %v779_v3, %v768_v5 }
 0x1ae   : > { %892 = vrot.lane.b32.xlu1 %v1479_v54, %s1287_s18  ;;  %906 = vrot.lane.b32.xlu2 %v1466_v46, %s1286_s17 }
 0x1af   : > { %890 = vrot.lane.b32.xlu0 %v1466_v46, %s1287_s18 }
 0x1b0   : > { %v755_v8 = vpop.permute.xlu1 %754  ;;  %v915_v11 = vpop.permute.xlu2 %914 }
 0x1b1   : > { %v739_v9 = vpop.permute.xlu0 %738 }
 0x1b2   : > { %v744_v29 = vadd.f32 %v739_v9, %v728_v25 }
 0x1b4   : > { %v760_v30 = vadd.f32 %v755_v8, %v744_v29 }
 0x1b6   : > { %v776_v36 = vadd.f32 %v771_v60, %v760_v30 }
 0x1b7   : > { %908 = vrot.lane.b32.xlu0 %v1479_v54, %s1286_s17 }
 0x1b8   : > { %v787_v10 = vpop.permute.xlu1 %786  ;;  %v733_v15 = vpop.permute.xlu2 %732 }
 0x1b9   : > { %v803_v12 = vpop.permute.xlu0 %802  ;;  %v792_v38 = vadd.f32 %v787_v10, %v776_v36 }
 0x1bb   : > { %v808_v40 = vadd.f32 %v803_v12, %v792_v38 }
 0x1bd   : > { %v824_v45 = vadd.f32 %v819_v1, %v808_v40 }
 0x1c0   : > { %v835_v13 = vpop.permute.xlu1 %834  ;;  %v757_v18 = vpop.permute.xlu2 %756 }
 0x1c1   : > { %v851_v14 = vpop.permute.xlu0 %850  ;;  %v840_v47 = vadd.f32 %v835_v13, %v824_v45 }
 0x1c3   : > { %v856_v51 = vadd.f32 %v851_v14, %v840_v47 }
 0x1c8   : > { %v883_v16 = vpop.permute.xlu1 %882  ;;  %v789_v24 = vpop.permute.xlu2 %788 }
 0x1c9   : > { %v899_v17 = vpop.permute.xlu0 %898 }
 0x1d0   : > { %v715_v19 = vpop.permute.xlu1 %714  ;;  %v837_v33 = vpop.permute.xlu2 %836 }
 0x1d1   : > { %v719_v20 = vadd.f32 %v715_v19, %v1479_v54  ;;  %v749_v21 = vpop.permute.xlu0 %748  ;;  %v872_v54 = vadd.f32 %v867_v7, %v856_v51 }
 0x1d3   : > { %v737_v22 = vadd.f32 %v733_v15, %v719_v20  ;;  %v888_v56 = vadd.f32 %v883_v16, %v872_v54 }
 0x1d5   : > { %v753_v23 = vadd.f32 %v749_v21, %v737_v22  ;;  %v904_v61 = vadd.f32 %v899_v17, %v888_v56 }
 0x1d7   : > { %v920_v0 = vadd.f32 %v915_v11, %v904_v61 }
 0x1d8   : > { %v765_v26 = vpop.permute.xlu1 %764  ;;  %v885_v44 = vpop.permute.xlu2 %884 }
 0x1d9   : > { %v769_v27 = vadd.f32 %v765_v26, %v753_v23  ;;  %v725_v28 = vpop.permute.xlu0 %724  ;;  %v933_v5 = vsel %vm922_vm4, %v920_v0, 0.0 }
 0x1da   : > { %v729_v31 = vadd.f32 %v725_v28, %v1525_v57 }
 0x1e0   : > { %v741_v32 = vpop.permute.xlu1 %740  ;;  %v781_v53 = vpop.permute.xlu2 %780 }
 0x1e1   : > { %v745_v34 = vadd.f32 %v741_v32, %v729_v31  ;;  %v773_v35 = vpop.permute.xlu0 %772  ;;  %v785_v20 = vadd.f32 %v781_v53, %v769_v27 }
 0x1e3   : > { %v761_v37 = vadd.f32 %v757_v18, %v745_v34 }
 0x1e5   : > { %v777_v39 = vadd.f32 %v773_v35, %v761_v37 }
 0x1e7   : > { %v793_v42 = vadd.f32 %v789_v24, %v777_v39 }
 0x1e8   : > { %v805_v41 = vpop.permute.xlu1 %804  ;;  %v811_v63 = vpop.permute.xlu2 %810 }
 0x1e9   : > { %v821_v43 = vpop.permute.xlu0 %820  ;;  %v809_v46 = vadd.f32 %v805_v41, %v793_v42 }
 0x1eb   : > { %v825_v48 = vadd.f32 %v821_v43, %v809_v46 }
 0x1ed   : > { %v841_v52 = vadd.f32 %v837_v33, %v825_v48 }
 0x1f0   : > { %v853_v49 = vpop.permute.xlu1 %852  ;;  %v829_v12 = vpop.permute.xlu2 %828 }
 0x1f1   : > { %v869_v50 = vpop.permute.xlu0 %868  ;;  %v857_v55 = vadd.f32 %v853_v49, %v841_v52 }
 0x1f3   : > { %v873_v59 = vadd.f32 %v869_v50, %v857_v55 }
 0x1f5   : > { %v889_v62 = vadd.f32 %v885_v44, %v873_v59 }
 0x1f8   : > { %v901_v57 = vpop.permute.xlu1 %900  ;;  %v859_v19 = vpop.permute.xlu2 %858 }
 0x1f9   : > { %v795_v58 = vpop.permute.xlu0 %794  ;;  %v905_v1 = vadd.f32 %v901_v57, %v889_v62 }
 0x1fa   : > { %v800_v60 = vadd.f32 %v795_v58, %v784_v6 }
 0x1fc   : > { %v816_v22 = vadd.f32 %v811_v63, %v800_v60 }
 0x200   : > { %v797_v2 = vpop.permute.xlu1 %796  ;;  %v877_v29 = vpop.permute.xlu2 %876 }
 0x201   : > { %v917_v3 = vpop.permute.xlu0 %916  ;;  %v801_v21 = vadd.f32 %v797_v2, %v785_v20 }
 0x202   : > { %v921_v4 = vadd.f32 %v917_v3, %v905_v1 }
 0x204   : > { %v934_v7 = vsel %vm924_vm5, %v921_v4, 0.0 }
 0x205   : > { %v935_v8 = vadd.f32 %v934_v7, %v933_v5 }
 0x207   : > { %v936_v9 = vrot.slane %v935_v8, 4 }
 0x208   : > { %v827_v10 = vpop.permute.xlu1 %826  ;;  %v907_v39 = vpop.permute.xlu2 %906 }
 0x209   : > { %v937_v13 = vadd.f32 %v936_v9, %v935_v8  ;;  %v813_v6 = vpop.permute.xlu0 %812  ;;  %v832_v24 = vadd.f32 %v827_v10, %v816_v22 }
 0x20a   : > { %v817_v25 = vadd.f32 %v813_v6, %v801_v21 }
 0x20b   : > { %v938_v14 = vrot.slane %v937_v13, 2 }
 0x20c   : > { %v833_v30 = vadd.f32 %v829_v12, %v817_v25 }
 0x20d   : > { %v939_v15 = vadd.f32 %v938_v14, %v937_v13 }
 0x20f   : > { %v940_v16 = vrot.slane %v939_v15, 1 }
 0x210   : > { %v845_v11 = vpop.permute.xlu1 %844 }
 0x211   : > { %v843_v17 = vpop.permute.xlu0 %842  ;;  %v941_v18 = vadd.f32 %v940_v16, %v939_v15  ;;  %v849_v31 = vadd.f32 %v845_v11, %v833_v30 }
 0x212   : > { %v848_v28 = vadd.f32 %v843_v17, %v832_v24 }
 0x213   : > { %943 = vrot.lane.b32.xlu1 %v941_v18, %s1288_s26 }
 0x214   : > { %v864_v32 = vadd.f32 %v859_v19, %v848_v28 }
 0x218   : > { %v875_v26 = vpop.permute.xlu1 %874 }
 0x219   : > { %v861_v23 = vpop.permute.xlu0 %860  ;;  %v880_v34 = vadd.f32 %v875_v26, %v864_v32 }
 0x21a   : > { %v865_v35 = vadd.f32 %v861_v23, %v849_v31 }
 0x21c   : > { %v881_v38 = vadd.f32 %v877_v29, %v865_v35 }
 0x220   : > { %v893_v37 = vpop.permute.xlu1 %892 }
 0x221   : > { %v891_v33 = vpop.permute.xlu0 %890  ;;  %v897_v27 = vadd.f32 %v893_v37, %v881_v38 }
 0x222   : > { %v896_v36 = vadd.f32 %v891_v33, %v880_v34 }
 0x224   : > { %v912_v40 = vadd.f32 %v907_v39, %v896_v36 }
 0x226   : > { %v923_v43 = vsel %vm922_vm4, %v912_v40, 0.0 }
 0x229   : > { %v909_v41 = vpop.permute.xlu0 %908 }
 0x22a   : > { %v913_v42 = vadd.f32 %v909_v41, %v897_v27 }
 0x22c   : > { %v925_v44 = vsel %vm924_vm5, %v913_v42, 0.0 }
 0x22d   : > { %v926_v45 = vadd.f32 %v925_v44, %v923_v43 }
 0x22f   : > { %v927_v46 = vrot.slane %v926_v45, 4 }
 0x231   : > { %v928_v47 = vadd.f32 %v927_v46, %v926_v45 }
 0x233   : > { %v929_v48 = vrot.slane %v928_v47, 2 }
 0x235   : > { %v930_v49 = vadd.f32 %v929_v48, %v928_v47 }
 0x237   : > { %v931_v50 = vrot.slane %v930_v49, 1 }
 0x239   : > { %v932_v51 = vadd.f32 %v931_v50, %v930_v49 }
 0x285   : > { %v944_v52 = vpop.permute.xlu1 %943 }
 0x286   : > { %v946_v53 = vsel %vm922_vm4, %v932_v51, %v944_v52 }
 0x287   : > { %948 = vst.msk [vmem:[%s206_s21] sm:$0x1] %vm947_vm6, %v946_v53 }
 0x288 PF: > { %s15_s15 = sadd.s32 1, %s1272_s15  }
 0x289   : > { %p12_p4 = scmp.ge.s32.totalorder %s15_s15, 4  }
 0x28b   :  { %14 = sbr.rel (!%p12_p4) target bundleno = 1 (0x1), region = 82 }

// kernel: tile.38
= control target key start
LH: loop header
LB: loop body
LE: loop exit
PB: predicated region body
PF: predicated region fallthrough
CT: control target
= control target key end

     0   :  { %s28_s0 = inlined_call_operand.vmem [shape: f32[8], index: 0, kind: input, shape index: {}]   ;;  %s29_s1 = inlined_call_operand.vmem [shape: f32[12,8], index: 1, kind: output, shape index: {}]  }
   0x1   :  { %v4_v0 = vld [vmem:[%s28_s0] ss:$0 sm:$0xff] }
   0x2   :  { %5 = vst [vmem:[%s29_s1] sm:$0xff] %v4_v0 }
   0x3   :  { %8 = vst [vmem:[%s29_s1 + $0x8] sm:$0xff] %v4_v0 }

// kernel: tile.39
= control target key start
LH: loop header
LB: loop body
LE: loop exit
PB: predicated region body
PF: predicated region fallthrough
CT: control target
= control target key end

     0   :  { %s99_s10 = smov 88   ;;  %s100_s11 = smov 72   ;;  %vm3_vm0 = vcmask 64512   ;;  %vm9_vm1 = vcmask 786112   ;;  %vm15_vm2 = vcmask 720512   ;;  %vm21_vm3 = vcmask 654912   ;;  %s159_s0 = inlined_call_operand.vmem [shape: f32[12,8], index: 0, kind: input, shape index: {}]   ;;  %s160_s1 = inlined_call_operand.vmem [shape: f32[1,96], index: 1, kind: output, shape index: {}]  }
   0x1   :  { %v77_v0 = vld [vmem:[%s159_s0 + $0xb] sm:$0x1]   ;;  %v79_v1 = vld [vmem:[%s159_s0 + $0x9] sm:$0x1]   ;;  %v81_v2 = vld [vmem:[%s159_s0 + $0x7] sm:$0x1]  }
   0x2   :  { %7 = vrot.lane.b32.xlu0 %v77_v0, %s99_s10  ;;  %19 = vrot.lane.b32.xlu1 %v79_v1, %s100_s11  ;;  %s101_s14 = smov 56   ;;  %v78_v3 = vld [vmem:[%s159_s0 + $0xa] sm:$0x1]   ;;  %v80_v4 = vld [vmem:[%s159_s0 + $0x8] sm:$0x1]   ;;  %s102_s19 = smov 80  }
   0x3   :  { %31 = vrot.lane.b32.xlu2 %v81_v2, %s101_s14  ;;  %s103_s20 = smov 64   ;;  %v82_v5 = vld [vmem:[%s159_s0 + $0x6] sm:$0x1]   ;;  %s104_s23 = smov 48   ;;  %v83_v6 = vld [vmem:[%s159_s0 + $0x5] sm:$0x1]  }
   0x4   :  { %v84_v7 = vld [vmem:[%s159_s0 + $0x4] sm:$0x1]   ;;  %s105_s28 = smov 40   ;;  %s106_s29 = smov 32   ;;  %v85_v8 = vld [vmem:[%s159_s0 + $0x3] sm:$0x1]  }
   0x5   :  { %s107_s3 = smov 24   ;;  %v86_v9 = vld [vmem:[%s159_s0 + $0x2] sm:$0x1]   ;;  %v87_v10 = vld [vmem:[%s159_s0 + $0x1] sm:$0x1]   ;;  %s108_s8 = smov 16  }
   0x6   :  { %s109_s9 = smov 8   ;;  %v2_v11 = vld [vmem:[%s159_s0] sm:$0x1]   ;;  %vm27_vm4 = vcmask 589312   ;;  %vm33_vm5 = vcmask 523712   ;;  %vm39_vm6 = vcmask 458112  }
   0x7   :  { %4 = vst.msk [vmem:[#allocation0] sm:$0x1] %vm3_vm0, %v2_v11   ;;  %vm45_vm7 = vcmask 392512   ;;  %vm51_vm8 = vcmask 326912   ;;  %vm57_vm9 = vcmask 261312   ;;  %vm63_vm10 = vcmask 195712  }
   0x8   :  { %vm69_vm11 = vcmask 130112  }
   0xa   :  { %13 = vrot.lane.b32.xlu0 %v78_v3, %s102_s19  ;;  %25 = vrot.lane.b32.xlu1 %v80_v4, %s103_s20 }
   0xb   :  { %37 = vrot.lane.b32.xlu2 %v82_v5, %s104_s23 }
  0x12   :  { %43 = vrot.lane.b32.xlu0 %v83_v6, %s105_s28  ;;  %49 = vrot.lane.b32.xlu1 %v84_v7, %s106_s29 }
  0x13   :  { %55 = vrot.lane.b32.xlu2 %v85_v8, %s107_s3 }
  0x1a   :  { %61 = vrot.lane.b32.xlu0 %v86_v9, %s108_s8  ;;  %67 = vrot.lane.b32.xlu1 %v87_v10, %s109_s9 }
  0x5d   :  { %v32_v12 = vpop.permute.xlu2 %31  }
  0x65   :  { %v38_v13 = vpop.permute.xlu2 %37  }
  0x6d   :  { %v56_v14 = vpop.permute.xlu2 %55  }
  0x74   :  { %v8_v15 = vpop.permute.xlu0 %7   ;;  %v20_v16 = vpop.permute.xlu1 %19  }
  0x75   :  { %10 = vst.msk [vmem:[#allocation0] sm:$0x1] %vm9_vm1, %v8_v15  }
  0x7c   :  { %v14_v17 = vpop.permute.xlu0 %13   ;;  %v26_v18 = vpop.permute.xlu1 %25  }
  0x7d   :  { %16 = vst.msk [vmem:[#allocation0] sm:$0x1] %vm15_vm2, %v14_v17  }
  0x7e   :  { %22 = vst.msk [vmem:[#allocation0] sm:$0x1] %vm21_vm3, %v20_v16  }
  0x7f   :  { %28 = vst.msk [vmem:[#allocation0] sm:$0x1] %vm27_vm4, %v26_v18  }
  0x80   :  { %34 = vst.msk [vmem:[#allocation0] sm:$0x1] %vm33_vm5, %v32_v12  }
  0x81   :  { %40 = vst.msk [vmem:[#allocation0] sm:$0x1] %vm39_vm6, %v38_v13  }
  0x84   :  { %v44_v19 = vpop.permute.xlu0 %43   ;;  %v50_v20 = vpop.permute.xlu1 %49  }
  0x85   :  { %46 = vst.msk [vmem:[#allocation0] sm:$0x1] %vm45_vm7, %v44_v19  }
  0x86   :  { %52 = vst.msk [vmem:[#allocation0] sm:$0x1] %vm51_vm8, %v50_v20  }
  0x87   :  { %58 = vst.msk [vmem:[#allocation0] sm:$0x1] %vm57_vm9, %v56_v14  }
  0x8c   :  { %v62_v21 = vpop.permute.xlu0 %61   ;;  %v68_v22 = vpop.permute.xlu1 %67  }
  0x8d   :  { %64 = vst.msk [vmem:[#allocation0] sm:$0x1] %vm63_vm10, %v62_v21  }
  0x8e   :  { %70 = vst.msk [vmem:[#allocation0] sm:$0x1] %vm69_vm11, %v68_v22  }
  0x95   :  { %v73_v23 = vld [vmem:[#allocation0] sm:$0x1] }
  0x96   :  { %76 = vst [vmem:[%s160_s1] sm:$0x1] %v73_v23 }

// kernel: decoder_block_forward.4
= control target key start
LH: loop header
LB: loop body
LE: loop exit
PB: predicated region body
PF: predicated region fallthrough
CT: control target
= control target key end

     0   :  { %s1685_s21 = smov 0   ;;  %s2003_s0 = inlined_call_operand.vmem [shape: bf16[2,14,112], index: 0, kind: input, shape index: {}]   ;;  %s2004_s1 = inlined_call_operand.vmem [shape: f32[1,112], index: 1, kind: input, shape index: {}]   ;;  %s2005_s2 = inlined_call_operand.vmem [shape: f32[1,112], index: 2, kind: input, shape index: {}]   ;;  %s2006_s3 = inlined_call_operand.vmem [shape: bf16[9,96,96], index: 3, kind: input, shape index: {}]   ;;  %s2007_s4 = inlined_call_operand.vmem [shape: f32[1,96], index: 4, kind: input, shape index: {}]   ;;  %s2008_s5 = inlined_call_operand.vmem [shape: bf16[2,12,96], index: 5, kind: output, shape index: {0}]   ;;  %s2009_s6 = inlined_call_operand.vmem [shape: f32[2,1,16], index: 6, kind: output, shape index: {1}]  }
   0x1 LB: > { %s1219_s22 = sadd.s32 4294967295, %s1636_s21   ;;  %p1223_p0 = scmp.ge.s32.totalorder %s1636_s21, 1  ;;  %s1636_s21 = sphi %s1685_s21, %s17_s21  }
   0x2   : > { %p215_p1 = scmp.lt.s32.totalorder %s1636_s21, 3 }
   0x4   : > { %p216_p2 = pnand %p1223_p0, %p215_p1 }
   0x5   : > { %p248_p3 = scmp.lt.s32.totalorder (!%p216_p2), %s1219_s22, 1  ;;  %s1638_s29 = smov (!%p216_p2), 120  }
   0x6   : > { %219 = sbr.rel (%p216_p2) target bundleno = 605 (0x25d), region = 40  ;;  %s1639_s20 = smov (!%p216_p2), 112  }
   0x7   : > { %s1640_s25 = smov (!%p216_p2), 104   ;;  %s1642_s26 = smov (!%p216_p2), 72  }
   0x8   : > { %s1643_s28 = smov (!%p216_p2), 88   ;;  %s1644_s30 = smov (!%p216_p2), 48  }
   0x9   : > { %s1645_s7 = smov (!%p216_p2), 80   ;;  %s1646_s8 = smov (!%p216_p2), 64  }
   0xa   : > { %s1647_s9 = smov (!%p216_p2), 56  }
   0xb   : > { %s2011_s22 = smov (!%p248_p3, %s1219_s22), 1  ;;  %v1564_v0 = vld [vmem:[%s2006_s3 + $0x58] sm:$0xff]  ;;  %v1558_v1 = vld [vmem:[%s2006_s3 + $0x28] sm:$0xff]  ;;  %v1627_v2 = vld [vmem:[%s2004_s1] ss:$0 sm:$0xff]  ;;  %vm350_vm0 = vcmask 785408  }
   0xc   : > { %s1551_s27 = sshll.u32 %s2011_s22, 3  ;;  %v1576_v3 = vld [vmem:[%s2006_s3 + $0xb8] sm:$0xff]  ;;  %356 = vmatpush.bf16.msra.mxu0 %v1564_v0  ;;  %v1563_v4 = vld [vmem:[%s2006_s3 + $0x50] sm:$0xff]  ;;  %409 = vmatpush.bf16.msra.mxu1 %v1558_v1  ;;  %v1557_v5 = vld [vmem:[%s2006_s3 + $0x20] sm:$0xff]  ;;  %vm922_vm1 = vcmask 781312   ;;  %vm924_vm2 = vcmask 779264   ;;  %s260_s12 = scalar_lea.vmem %s2009_s6, %s2011_s22 }
   0xd   : > { %s252_s10 = scalar_lea.vmem %s2003_s0, %s1551_s27  ;;  %v1570_v6 = vld [vmem:[%s2006_s3 + $0x88] sm:$0xff]  ;;  %551 = vmatpush.bf16.msra.mxu3 %v1576_v3  ;;  %v1575_v9 = vld [vmem:[%s2006_s3 + $0xb0] sm:$0xff]  ;;  %v1628_v12 = vld [vmem:[%s2005_s2] ss:$0 sm:$0xff]  ;;  %s257_s24 = scalar_lea.vmem %s2008_s5, %s1551_s27  ;;  %vm1112_vm3 = vcmask 64512   ;;  %vm1114_vm4 = vcmask 60416  }
   0xe   : > { %v262_v7 = vld [vmem:[%s252_s10] sm:$0xf]  ;;  %v263_v8 = vld [vmem:[%s252_s10 + $0x4] sm:$0x7]  ;;  %477 = vmatpush.bf16.msra.mxu2 %v1570_v6  ;;  %v1562_v16 = vld [vmem:[%s2006_s3 + $0x48] sm:$0xff]  ;;  %s1641_s27 = smov 96  }
   0xf   : > { %v264_v10 = vunpack.c.l.bf16 %v262_v7  ;;  %v265_v11 = vunpack.c.l.bf16 %v263_v8  ;;  %v1569_v13 = vld [vmem:[%s2006_s3 + $0x80] sm:$0xff]  ;;  %v1556_v17 = vld [vmem:[%s2006_s3 + $0x18] sm:$0xff]  ;;  %v1574_v18 = vld [vmem:[%s2006_s3 + $0xa8] sm:$0xff]  ;;  %s1648_s10 = smov 40   ;;  %vm1137_vm5 = vcmask 122880  }
  0x10   : > { %357 = vmatpush.bf16.msra.mxu0 %v1563_v4  ;;  %410 = vmatpush.bf16.msra.mxu1 %v1557_v5  ;;  %v1568_v21 = vld [vmem:[%s2006_s3 + $0x78] sm:$0xff]  ;;  %v1561_v24 = vld [vmem:[%s2006_s3 + $0x40] sm:$0xff]  ;;  %v1555_v25 = vld [vmem:[%s2006_s3 + $0x10] sm:$0xff] }
  0x11   : > { %v270_v14 = vmul.f32 %v1627_v2, %v264_v10  ;;  %v271_v15 = vmul.f32 %v1627_v2, %v265_v11  ;;  %552 = vmatpush.bf16.msra.mxu3 %v1575_v9  ;;  %v1573_v26 = vld [vmem:[%s2006_s3 + $0xa0] sm:$0xff]  ;;  %v1567_v29 = vld [vmem:[%s2006_s3 + $0x70] sm:$0xff]  ;;  %v1560_v32 = vld [vmem:[%s2006_s3 + $0x38] sm:$0xff] }
  0x12   : > { %478 = vmatpush.bf16.msra.mxu2 %v1569_v13  ;;  %v1554_v33 = vld [vmem:[%s2006_s3 + $0x8] sm:$0xff]  ;;  %v1572_v34 = vld [vmem:[%s2006_s3 + $0x98] sm:$0xff]  ;;  %v1559_v39 = vld [vmem:[%s2006_s3 + $0x30] sm:$0xff] }
  0x13   : > { %v276_v19 = vadd.f32 %v1628_v12, %v270_v14  ;;  %v277_v20 = vadd.f32 %v1628_v12, %v271_v15  ;;  %v1566_v36 = vld [vmem:[%s2006_s3 + $0x68] sm:$0xff]  ;;  %v1553_v41 = vld [vmem:[%s2006_s3] sm:$0xff]  ;;  %v1571_v43 = vld [vmem:[%s2006_s3 + $0x90] sm:$0xff] }
  0x14   : > { %358 = vmatpush.bf16.msra.mxu0 %v1562_v16  ;;  %411 = vmatpush.bf16.msra.mxu1 %v1556_v17  ;;  %v1582_v40 = vld [vmem:[%s2006_s3 + $0xe8] sm:$0xff]  ;;  %v1588_v44 = vld [vmem:[%s2006_s3 + $0x118] sm:$0xff]  ;;  %v1581_v47 = vld [vmem:[%s2006_s3 + $0xe0] sm:$0xff] }
  0x15   : > { %v278_v22 = vmax.f32 %v276_v19, 0.0  ;;  %v279_v23 = vmax.f32 %v277_v20, 0.0  ;;  %553 = vmatpush.bf16.msra.mxu3 %v1574_v18  ;;  %v1600_v46 = vld [vmem:[%s2006_s3 + $0x178] sm:$0xff]  ;;  %v1587_v48 = vld [vmem:[%s2006_s3 + $0x110] sm:$0xff]  ;;  %v1565_v52 = vld [vmem:[%s2006_s3 + $0x60] sm:$0xff] }
  0x16   : > { %479 = vmatpush.bf16.msra.mxu2 %v1568_v21  ;;  %v1599_v49 = vld [vmem:[%s2006_s3 + $0x170] sm:$0xff]  ;;  %v1580_v50 = vld [vmem:[%s2006_s3 + $0xd8] sm:$0xff]  ;;  %v1594_v54 = vld [vmem:[%s2006_s3 + $0x148] sm:$0xff] }
  0x17   : > { %v280_v27 = vpack.c.bf16 %v278_v22, %v278_v22  ;;  %v281_v28 = vpack.c.bf16 %v279_v23, %v279_v23  ;;  %v1579_v53 = vld [vmem:[%s2006_s3 + $0xd0] sm:$0xff]  ;;  %v1586_v55 = vld [vmem:[%s2006_s3 + $0x108] sm:$0xff]  ;;  %v1593_v58 = vld [vmem:[%s2006_s3 + $0x140] sm:$0xff] }
  0x18   : > { %359 = vmatpush.bf16.msra.mxu0 %v1561_v24  ;;  %412 = vmatpush.bf16.msra.mxu1 %v1555_v25  ;;  %v1598_v56 = vld [vmem:[%s2006_s3 + $0x168] sm:$0xff]  ;;  %v1585_v59 = vld [vmem:[%s2006_s3 + $0x100] sm:$0xff]  ;;  %v1592_v62 = vld [vmem:[%s2006_s3 + $0x138] sm:$0xff] }
  0x19   : > { %v309_v30 = vunpack.c.l.b16 %v280_v27  ;;  %v310_v31 = vunpack.c.l.b16 %v281_v28  ;;  %554 = vmatpush.bf16.msra.mxu3 %v1573_v26  ;;  %v1578_v57 = vld [vmem:[%s2006_s3 + $0xc8] sm:$0xff]  ;;  %v1597_v60 = vld [vmem:[%s2006_s3 + $0x160] sm:$0xff]  ;;  %v1584_v63 = vld [vmem:[%s2006_s3 + $0xf8] sm:$0xff] }
  0x1a   : > { %480 = vmatpush.bf16.msra.mxu2 %v1567_v29  ;;  %v1577_v61 = vld [vmem:[%s2006_s3 + $0xc0] sm:$0xff]  ;;  %v1596_v0 = vld [vmem:[%s2006_s3 + $0x158] sm:$0xff]  ;;  %v1591_v1 = vld [vmem:[%s2006_s3 + $0x130] sm:$0xff] }
  0x1b   : > { %v311_v35 = vpack.c.b16 %v310_v31, %v309_v30  ;;  %v1583_v2 = vld [vmem:[%s2006_s3 + $0xf0] sm:$0xff]  ;;  %v1590_v4 = vld [vmem:[%s2006_s3 + $0x128] sm:$0xff]  ;;  %v1589_v6 = vld [vmem:[%s2006_s3 + $0x120] sm:$0xff] }
  0x1c   : > { %360 = vmatpush.bf16.msra.mxu0 %v1560_v32  ;;  %413 = vmatpush.bf16.msra.mxu1 %v1554_v33  ;;  %v1595_v3 = vld [vmem:[%s2006_s3 + $0x150] sm:$0xff]  ;;  %v1606_v7 = vld [vmem:[%s2006_s3 + $0x1a8] sm:$0xff]  ;;  %v1605_v9 = vld [vmem:[%s2006_s3 + $0x1a0] sm:$0xff] }
  0x1d   : > { %312 = vrot.lane.b32.xlu0 %v311_v35, %s1638_s29  ;;  %v504_v37 = vshrl.u32 %v311_v35, 16  ;;  %v506_v38 = vshll.u32 %v311_v35, 16  ;;  %555 = vmatpush.bf16.msra.mxu3 %v1572_v34  ;;  %v1801_v51 = vrot.slane %v311_v35, 1  ;;  %v1604_v11 = vld [vmem:[%s2006_s3 + $0x198] sm:$0xff]  ;;  %v1603_v13 = vld [vmem:[%s2006_s3 + $0x190] sm:$0xff]  ;;  %v1602_v15 = vld [vmem:[%s2006_s3 + $0x188] sm:$0xff] }
  0x1e   : > { %481 = vmatpush.bf16.msra.mxu2 %v1566_v36  ;;  %v1601_v16 = vld [vmem:[%s2006_s3 + $0x180] sm:$0xff] }
  0x1f   : > { %v508_v42 = vrot.slane %v506_v38, 1 }
  0x20   : > { %361 = vmatpush.bf16.msra.mxu0 %v1559_v39  ;;  %414 = vmatpush.bf16.msra.mxu1 %v1553_v41 }
  0x21   : > { %v509_v45 = vor.u32 %v508_v42, %v504_v37  ;;  %556 = vmatpush.bf16.msra.mxu3 %v1571_v43  ;;  %v1629_v43 = vld [vmem:[%s2007_s4] ss:$0 sm:$0xff] }
  0x22   : > { %482 = vmatpush.bf16.msra.mxu2 %v1565_v52 }
  0x23   : > { %578 = vrot.lane.b32.xlu1 %v509_v45, %s1638_s29  ;;  %648 = vrot.lane.b32.xlu2 %v509_v45, %s1639_s20 }
  0x24   : > { %621 = vmatpush.bf16.msrb.mxu0 %v1582_v40  ;;  %691 = vmatpush.bf16.msrb.mxu1 %v1588_v44 }
  0x25   : > { %434 = vrot.lane.b32.xlu0 %v311_v35, %s1639_s20  ;;  %830 = vmatpush.bf16.msrb.mxu3 %v1600_v46 }
  0x26   : > { %1289 = vmatmul.msk.bf16.vlgmr.msra.gmra.mxu1 %vm350_vm0, %v311_v35  ;;  %760 = vmatpush.bf16.msrb.mxu2 %v1594_v54 }
  0x27   : > { %1363 = vmatmul.msk.bf16.vlgmr.msra.gmra.mxu3 %vm350_vm0, %v509_v45 }
  0x28   : > { %622 = vmatpush.bf16.msrb.mxu0 %v1581_v47  ;;  %692 = vmatpush.bf16.msrb.mxu1 %v1587_v48 }
  0x29   : > { %831 = vmatpush.bf16.msrb.mxu3 %v1599_v49 }
  0x2a   : > { %761 = vmatpush.bf16.msrb.mxu2 %v1593_v58 }
  0x2b   : > { %787 = vrot.lane.b32.xlu1 %v1801_v51, %s1638_s29  ;;  %857 = vrot.lane.b32.xlu2 %v1801_v51, %s1639_s20 }
  0x2c   : > { %623 = vmatpush.bf16.msrb.mxu0 %v1580_v50  ;;  %693 = vmatpush.bf16.msrb.mxu1 %v1586_v55 }
  0x2d   : > { %832 = vmatpush.bf16.msrb.mxu3 %v1598_v56 }
  0x2e   : > { %762 = vmatpush.bf16.msrb.mxu2 %v1592_v62 }
  0x30   : > { %624 = vmatpush.bf16.msrb.mxu0 %v1579_v53  ;;  %694 = vmatpush.bf16.msrb.mxu1 %v1585_v59 }
  0x31   : > { %833 = vmatpush.bf16.msrb.mxu3 %v1597_v60 }
  0x32   : > { %763 = vmatpush.bf16.msrb.mxu2 %v1591_v1 }
  0x34   : > { %625 = vmatpush.bf16.msrb.mxu0 %v1578_v57  ;;  %695 = vmatpush.bf16.msrb.mxu1 %v1584_v63 }
  0x35   : > { %834 = vmatpush.bf16.msrb.mxu3 %v1596_v0 }
  0x36   : > { %764 = vmatpush.bf16.msrb.mxu2 %v1590_v4 }
  0x38   : > { %626 = vmatpush.bf16.msrb.mxu0 %v1577_v61  ;;  %696 = vmatpush.bf16.msrb.mxu1 %v1583_v2 }
  0x39   : > { %835 = vmatpush.bf16.msrb.mxu3 %v1595_v3 }
  0x3a   : > { %765 = vmatpush.bf16.msrb.mxu2 %v1589_v6 }
  0x7d   : > { %v649_v5 = vpop.permute.xlu2 %648 }
  0x7e   : > { %1437 = vmatmul.msk.bf16.vlgmr.msrb.gmra.mxu1 %vm350_vm0, %v649_v5 }
  0x85   : > { %v858_v17 = vpop.permute.xlu2 %857 }
  0x8f   : > { %v313_v8 = vpop.permute.xlu0 %312 }
  0x90   : > { %1264 = vmatmul.msk.bf16.vlgmr.msra.gmra.mxu0 %vm350_vm0, %v313_v8 }
  0x91   : > { %900 = vmatpush.bf16.msra.mxu0 %v1606_v7 }
  0x95   : > { %v579_v10 = vpop.permute.xlu1 %578  ;;  %901 = vmatpush.bf16.msra.mxu0 %v1605_v9 }
  0x97   : > { %v435_v12 = vpop.permute.xlu0 %434 }
  0x98   : > { %1326 = vmatmul.msk.bf16.vlgmr.msra.gmra.mxu2 %vm350_vm0, %v435_v12 }
  0x99   : > { %902 = vmatpush.bf16.msra.mxu0 %v1604_v11 }
  0x9d   : > { %v788_v14 = vpop.permute.xlu1 %787  ;;  %903 = vmatpush.bf16.msra.mxu0 %v1603_v13 }
  0x9e   : > { %1511 = vmatmul.msk.bf16.vlgmr.msrb.gmra.mxu3 %vm350_vm0, %v788_v14 }
  0xa0   : > { %1400 = vmatmul.msk.bf16.vlgmr.msrb.gmra.mxu0 %vm350_vm0, %v579_v10 }
  0xa1   : > { %904 = vmatpush.bf16.msra.mxu0 %v1602_v15 }
  0xa3   : > { %v416_v19 = vpop.f32.mrf.mxu1 }
  0xa5   : > { %905 = vmatpush.bf16.msra.mxu0 %v1601_v16 }
  0xa8   : > { %1474 = vmatmul.msk.bf16.vlgmr.msrb.gmra.mxu2 %vm350_vm0, %v1801_v51 }
  0xaa   : > { %v558_v21 = vpop.f32.mrf.mxu3 }
  0xab   : > { %v418_v26 = vpop.f32.mrf.mxu1 }
  0xb0   : > { %1548 = vmatmul.msk.bf16.vlgmr.msra.gmra.mxu0 %vm350_vm0, %v858_v17 }
  0xb2   : > { %v560_v27 = vpop.f32.mrf.mxu3 }
  0xfb   : > { %v698_v34 = vpop.f32.mrf.mxu1 }
 0x103   : > { %v700_v45 = vpop.f32.mrf.mxu1 }
 0x10d   : > { %v363_v18 = vpop.f32.mrf.mxu0 }
 0x10e   : > { %v417_v23 = vadd.f32 %v416_v19, %v363_v18 }
 0x115   : > { %v365_v20 = vpop.f32.mrf.mxu0 }
 0x116   : > { %v419_v30 = vadd.f32 %v418_v26, %v365_v20 }
 0x11b   : > { %v484_v22 = vpop.f32.mrf.mxu2 }
 0x11c   : > { %v489_v25 = vadd.f32 %v484_v22, %v417_v23 }
 0x11d   : > { %v628_v24 = vpop.f32.mrf.mxu0 }
 0x11e   : > { %v563_v28 = vadd.f32 %v558_v21, %v489_v25 }
 0x120   : > { %v633_v32 = vadd.f32 %v628_v24, %v563_v28 }
 0x121   : > { %v837_v37 = vpop.f32.mrf.mxu3 }
 0x122   : > { %v703_v35 = vadd.f32 %v698_v34, %v633_v32 }
 0x123   : > { %v486_v29 = vpop.f32.mrf.mxu2 }
 0x124   : > { %v490_v33 = vadd.f32 %v486_v29, %v419_v30 }
 0x125   : > { %v630_v31 = vpop.f32.mrf.mxu0 }
 0x126   : > { %v564_v36 = vadd.f32 %v560_v27, %v490_v33 }
 0x128   : > { %v634_v41 = vadd.f32 %v630_v31, %v564_v36 }
 0x129   : > { %v839_v51 = vpop.f32.mrf.mxu3 }
 0x12a   : > { %v704_v46 = vadd.f32 %v700_v45, %v634_v41 }
 0x12b   : > { %v767_v38 = vpop.f32.mrf.mxu2 }
 0x12c   : > { %v772_v39 = vadd.f32 %v767_v38, %v703_v35 }
 0x12d   : > { %v907_v40 = vpop.f32.mrf.mxu0 }
 0x12e   : > { %v842_v42 = vadd.f32 %v837_v37, %v772_v39 }
 0x130   : > { %v912_v44 = vadd.f32 %v907_v40, %v842_v42 }
 0x132   : > { %v1892_v47 = vadd.f32 %v1629_v43, %v912_v44 }
 0x133   : > { %v769_v48 = vpop.f32.mrf.mxu2 }
 0x134   : > { %v920_v49 = vpack.c.bf16 %v1892_v47, %v1892_v47  ;;  %v773_v50 = vadd.f32 %v769_v48, %v704_v46  ;;  %968 = vrot.lane.b32.xlu2 %v1892_v47, %s1640_s25  ;;  %952 = vrot.lane.b32.xlu1 %v1892_v47, %s1639_s20  ;;  %v1911_v56 = vmul.f32 %v1892_v47, %v1892_v47 }
 0x135   : > { %934 = vrot.lane.b32.xlu0 %v1892_v47, %s1638_s29  ;;  %v909_v53 = vpop.f32.mrf.mxu0 }
 0x136   : > { %923 = vst.msk [vmem:[%s257_s24] sm:$0xf] %vm922_vm1, %v920_v49  ;;  %v843_v52 = vadd.f32 %v839_v51, %v773_v50 }
 0x138   : > { %v913_v54 = vadd.f32 %v909_v53, %v843_v52 }
 0x13a   : > { %v1907_v55 = vadd.f32 %v1629_v43, %v913_v54 }
 0x13c   : > { %v921_v57 = vpack.c.bf16 %v1907_v55, %v1907_v55  ;;  %992 = vrot.lane.b32.xlu1 %v1911_v56, %s1641_s27  ;;  %944 = vrot.lane.b32.xlu2 %v1911_v56, %s1638_s29  ;;  %v927_v58 = vmul.f32 %v1907_v55, %v1907_v55 }
 0x13d   : > { %960 = vrot.lane.b32.xlu0 %v1911_v56, %s1639_s20 }
 0x13e   : > { %925 = vst.msk [vmem:[%s257_s24 + $0x4] sm:$0x3] %vm924_vm2, %v921_v57 }
 0x144   : > { %1040 = vrot.lane.b32.xlu1 %v1911_v56, %s1642_s26  ;;  %976 = vrot.lane.b32.xlu2 %v1911_v56, %s1640_s25 }
 0x145   : > { %1008 = vrot.lane.b32.xlu0 %v1911_v56, %s1643_s28 }
 0x14c   : > { %1088 = vrot.lane.b32.xlu1 %v1911_v56, %s1644_s30  ;;  %1024 = vrot.lane.b32.xlu2 %v1911_v56, %s1645_s7 }
 0x14d   : > { %1056 = vrot.lane.b32.xlu0 %v1911_v56, %s1646_s8 }
 0x154   : > { %936 = vrot.lane.b32.xlu1 %v1907_v55, %s1638_s29  ;;  %1072 = vrot.lane.b32.xlu2 %v1911_v56, %s1647_s9 }
 0x155   : > { %1104 = vrot.lane.b32.xlu0 %v1911_v56, %s1648_s10 }
 0x15c   : > { %962 = vrot.lane.b32.xlu1 %v927_v58, %s1639_s20  ;;  %954 = vrot.lane.b32.xlu2 %v1907_v55, %s1639_s20 }
 0x15d   : > { %946 = vrot.lane.b32.xlu0 %v927_v58, %s1638_s29  ;;  %s1649_s29 = smov 8  }
 0x164   : > { %1010 = vrot.lane.b32.xlu1 %v927_v58, %s1643_s28  ;;  %994 = vrot.lane.b32.xlu2 %v927_v58, %s1641_s27 }
 0x165   : > { %978 = vrot.lane.b32.xlu0 %v927_v58, %s1640_s25 }
 0x16c   : > { %1058 = vrot.lane.b32.xlu1 %v927_v58, %s1646_s8  ;;  %1042 = vrot.lane.b32.xlu2 %v927_v58, %s1642_s26 }
 0x16d   : > { %1026 = vrot.lane.b32.xlu0 %v927_v58, %s1645_s7 }
 0x174   : > { %984 = vrot.lane.b32.xlu1 %v1892_v47, %s1641_s27  ;;  %1090 = vrot.lane.b32.xlu2 %v927_v58, %s1644_s30 }
 0x175   : > { %1074 = vrot.lane.b32.xlu0 %v927_v58, %s1647_s9 }
 0x17c   : > { %1106 = vrot.lane.b32.xlu1 %v927_v58, %s1648_s10  ;;  %986 = vrot.lane.b32.xlu2 %v1907_v55, %s1641_s27 }
 0x17d   : > { %970 = vrot.lane.b32.xlu0 %v1907_v55, %s1640_s25 }
 0x184   : > { %1002 = vrot.lane.b32.xlu1 %v1907_v55, %s1643_s28  ;;  %1016 = vrot.lane.b32.xlu2 %v1892_v47, %s1645_s7 }
 0x185   : > { %1000 = vrot.lane.b32.xlu0 %v1892_v47, %s1643_s28 }
 0x18c   : > { %1032 = vrot.lane.b32.xlu1 %v1892_v47, %s1642_s26  ;;  %1034 = vrot.lane.b32.xlu2 %v1907_v55, %s1642_s26 }
 0x18d   : > { %1018 = vrot.lane.b32.xlu0 %v1907_v55, %s1645_s7 }
 0x18e   : > { %v969_v59 = vpop.permute.xlu2 %968 }
 0x194   : > { %1050 = vrot.lane.b32.xlu1 %v1907_v55, %s1646_s8  ;;  %1064 = vrot.lane.b32.xlu2 %v1892_v47, %s1647_s9 }
 0x195   : > { %1048 = vrot.lane.b32.xlu0 %v1892_v47, %s1646_s8 }
 0x196   : > { %v945_v60 = vpop.permute.xlu2 %944 }
 0x197   : > { %v950_v16 = vadd.f32 %v945_v60, %v1911_v56 }
 0x19c   : > { %1080 = vrot.lane.b32.xlu1 %v1892_v47, %s1644_s30  ;;  %1082 = vrot.lane.b32.xlu2 %v1907_v55, %s1644_s30 }
 0x19d   : > { %1066 = vrot.lane.b32.xlu0 %v1907_v55, %s1647_s9 }
 0x19e   : > { %v977_v61 = vpop.permute.xlu2 %976 }
 0x1a4   : > { %1098 = vrot.lane.b32.xlu1 %v1907_v55, %s1648_s10 }
 0x1a5   : > { %1096 = vrot.lane.b32.xlu0 %v1892_v47, %s1648_s10 }
 0x1a6   : > { %v953_v62 = vpop.permute.xlu1 %952  ;;  %v1025_v5 = vpop.permute.xlu2 %1024 }
 0x1a7   : > { %v935_v63 = vpop.permute.xlu0 %934 }
 0x1a8   : > { %v940_v0 = vadd.f32 %v935_v63, %v1892_v47 }
 0x1aa   : > { %v958_v1 = vadd.f32 %v953_v62, %v940_v0 }
 0x1ac   : > { %v974_v2 = vadd.f32 %v969_v59, %v958_v1 }
 0x1ae   : > { %v993_v3 = vpop.permute.xlu1 %992  ;;  %v1073_v8 = vpop.permute.xlu2 %1072 }
 0x1af   : > { %v961_v4 = vpop.permute.xlu0 %960 }
 0x1b0   : > { %v966_v19 = vadd.f32 %v961_v4, %v950_v16 }
 0x1b2   : > { %v982_v22 = vadd.f32 %v977_v61, %v966_v19 }
 0x1b4   : > { %v998_v25 = vadd.f32 %v993_v3, %v982_v22 }
 0x1b6   : > { %v1041_v6 = vpop.permute.xlu1 %1040  ;;  %v955_v11 = vpop.permute.xlu2 %954 }
 0x1b7   : > { %v1009_v7 = vpop.permute.xlu0 %1008 }
 0x1b8   : > { %v1014_v29 = vadd.f32 %v1009_v7, %v998_v25 }
 0x1ba   : > { %v1030_v31 = vadd.f32 %v1025_v5, %v1014_v29 }
 0x1bc   : > { %v1046_v36 = vadd.f32 %v1041_v6, %v1030_v31 }
 0x1be   : > { %v1089_v9 = vpop.permute.xlu1 %1088  ;;  %v995_v17 = vpop.permute.xlu2 %994 }
 0x1bf   : > { %v1057_v10 = vpop.permute.xlu0 %1056 }
 0x1c0   : > { %v1062_v38 = vadd.f32 %v1057_v10, %v1046_v36 }
 0x1c2   : > { %v1078_v41 = vadd.f32 %v1073_v8, %v1062_v38 }
 0x1c4   : > { %v1094_v46 = vadd.f32 %v1089_v9, %v1078_v41 }
 0x1c6   : > { %v937_v12 = vpop.permute.xlu1 %936  ;;  %v1043_v27 = vpop.permute.xlu2 %1042 }
 0x1c7   : > { %v941_v13 = vadd.f32 %v937_v12, %v1907_v55  ;;  %v1105_v14 = vpop.permute.xlu0 %1104 }
 0x1c8   : > { %v1110_v48 = vadd.f32 %v1105_v14, %v1094_v46 }
 0x1c9   : > { %v959_v15 = vadd.f32 %v955_v11, %v941_v13 }
 0x1ca   : > { %v1123_v53 = vsel %vm1112_vm3, %v1110_v48, 0.0 }
 0x1ce   : > { %v963_v18 = vpop.permute.xlu1 %962  ;;  %v1091_v37 = vpop.permute.xlu2 %1090 }
 0x1cf   : > { %v947_v20 = vpop.permute.xlu0 %946 }
 0x1d0   : > { %v951_v21 = vadd.f32 %v947_v20, %v927_v58 }
 0x1d2   : > { %v967_v24 = vadd.f32 %v963_v18, %v951_v21 }
 0x1d6   : > { %v1011_v23 = vpop.permute.xlu1 %1010  ;;  %v987_v47 = vpop.permute.xlu2 %986 }
 0x1d7   : > { %v979_v26 = vpop.permute.xlu0 %978 }
 0x1d8   : > { %v983_v28 = vadd.f32 %v979_v26, %v967_v24 }
 0x1da   : > { %v999_v30 = vadd.f32 %v995_v17, %v983_v28 }
 0x1dc   : > { %v1015_v33 = vadd.f32 %v1011_v23, %v999_v30 }
 0x1de   : > { %v1059_v32 = vpop.permute.xlu1 %1058  ;;  %v1017_v57 = vpop.permute.xlu2 %1016 }
 0x1df   : > { %v1027_v34 = vpop.permute.xlu0 %1026 }
 0x1e0   : > { %v1031_v35 = vadd.f32 %v1027_v34, %v1015_v33 }
 0x1e2   : > { %v1047_v39 = vadd.f32 %v1043_v27, %v1031_v35 }
 0x1e4   : > { %v1063_v44 = vadd.f32 %v1059_v32, %v1047_v39 }
 0x1e6   : > { %v985_v40 = vpop.permute.xlu1 %984  ;;  %v1035_v3 = vpop.permute.xlu2 %1034 }
 0x1e7   : > { %v990_v42 = vadd.f32 %v985_v40, %v974_v2  ;;  %v1075_v43 = vpop.permute.xlu0 %1074 }
 0x1e8   : > { %v1079_v45 = vadd.f32 %v1075_v43, %v1063_v44 }
 0x1ea   : > { %v1095_v49 = vadd.f32 %v1091_v37, %v1079_v45 }
 0x1ee   : > { %v1107_v50 = vpop.permute.xlu1 %1106  ;;  %v1065_v11 = vpop.permute.xlu2 %1064 }
 0x1ef   : > { %v1111_v51 = vadd.f32 %v1107_v50, %v1095_v49  ;;  %v971_v52 = vpop.permute.xlu0 %970 }
 0x1f0   : > { %v975_v4 = vadd.f32 %v971_v52, %v959_v15 }
 0x1f1   : > { %v1124_v54 = vsel %vm1114_vm4, %v1111_v51, 0.0 }
 0x1f2   : > { %v1125_v55 = vadd.f32 %v1124_v54, %v1123_v53  ;;  %v991_v5 = vadd.f32 %v987_v47, %v975_v4 }
 0x1f4   : > { %v1126_v56 = vrot.slane %v1125_v55, 4 }
 0x1f6   : > { %v1127_v58 = vadd.f32 %v1126_v56, %v1125_v55  ;;  %v1003_v59 = vpop.permute.xlu1 %1002  ;;  %v1083_v21 = vpop.permute.xlu2 %1082 }
 0x1f7   : > { %v1001_v60 = vpop.permute.xlu0 %1000  ;;  %v1007_v7 = vadd.f32 %v1003_v59, %v991_v5 }
 0x1f8   : > { %v1128_v61 = vrot.slane %v1127_v58, 2  ;;  %v1006_v9 = vadd.f32 %v1001_v60, %v990_v42 }
 0x1fa   : > { %v1129_v62 = vadd.f32 %v1128_v61, %v1127_v58  ;;  %v1022_v12 = vadd.f32 %v1017_v57, %v1006_v9 }
 0x1fc   : > { %v1130_v63 = vrot.slane %v1129_v62, 1 }
 0x1fe   : > { %v1033_v0 = vpop.permute.xlu1 %1032  ;;  %v1131_v1 = vadd.f32 %v1130_v63, %v1129_v62 }
 0x1ff   : > { %v1019_v2 = vpop.permute.xlu0 %1018  ;;  %v1038_v14 = vadd.f32 %v1033_v0, %v1022_v12 }
 0x200   : > { %1133 = vrot.lane.b32.xlu2 %v1131_v1, %s1649_s29  ;;  %v1023_v10 = vadd.f32 %v1019_v2, %v1007_v7 }
 0x202   : > { %v1039_v13 = vadd.f32 %v1035_v3, %v1023_v10 }
 0x206   : > { %v1051_v6 = vpop.permute.xlu1 %1050 }
 0x207   : > { %v1049_v8 = vpop.permute.xlu0 %1048  ;;  %v1055_v17 = vadd.f32 %v1051_v6, %v1039_v13 }
 0x208   : > { %v1054_v19 = vadd.f32 %v1049_v8, %v1038_v14 }
 0x20a   : > { %v1070_v22 = vadd.f32 %v1065_v11, %v1054_v19 }
 0x20e   : > { %v1081_v16 = vpop.permute.xlu1 %1080 }
 0x20f   : > { %v1067_v18 = vpop.permute.xlu0 %1066  ;;  %v1086_v15 = vadd.f32 %v1081_v16, %v1070_v22 }
 0x210   : > { %v1071_v20 = vadd.f32 %v1067_v18, %v1055_v17 }
 0x212   : > { %v1087_v23 = vadd.f32 %v1083_v21, %v1071_v20 }
 0x216   : > { %v1099_v24 = vpop.permute.xlu1 %1098 }
 0x217   : > { %v1103_v25 = vadd.f32 %v1099_v24, %v1087_v23  ;;  %v1097_v26 = vpop.permute.xlu0 %1096 }
 0x218   : > { %v1102_v27 = vadd.f32 %v1097_v26, %v1086_v15 }
 0x219   : > { %v1115_v28 = vsel %vm1114_vm4, %v1103_v25, 0.0 }
 0x21a   : > { %v1113_v29 = vsel %vm1112_vm3, %v1102_v27, 0.0 }
 0x21b   : > { %v1116_v30 = vadd.f32 %v1115_v28, %v1113_v29 }
 0x21d   : > { %v1117_v31 = vrot.slane %v1116_v30, 4 }
 0x21f   : > { %v1118_v32 = vadd.f32 %v1117_v31, %v1116_v30 }
 0x221   : > { %v1119_v33 = vrot.slane %v1118_v32, 2 }
 0x223   : > { %v1120_v34 = vadd.f32 %v1119_v33, %v1118_v32 }
 0x225   : > { %v1121_v35 = vrot.slane %v1120_v34, 1 }
 0x227   : > { %v1122_v36 = vadd.f32 %v1121_v35, %v1120_v34 }
 0x25a   : > { %v1134_v37 = vpop.permute.xlu2 %1133 }
 0x25b   : > { %v1136_v38 = vsel %vm1112_vm3, %v1122_v36, %v1134_v37 }
 0x25c   : > { %1138 = vst.msk [vmem:[%s260_s12] sm:$0x1] %vm1137_vm5, %v1136_v38 }
 0x25d PF: > { %s17_s21 = sadd.s32 1, %s1636_s21  }
 0x25e   : > { %p14_p4 = scmp.ge.s32.totalorder %s17_s21, 4  }
 0x260   :  { %16 = sbr.rel (!%p14_p4) target bundleno = 1 (0x1), region = 90 }

// kernel: tile.42
= control target key start
LH: loop header
LB: loop body
LE: loop exit
PB: predicated region body
PF: predicated region fallthrough
CT: control target
= control target key end

     0   :  { %s34_s0 = inlined_call_operand.vmem [shape: f32[4], index: 0, kind: input, shape index: {}]   ;;  %s35_s1 = inlined_call_operand.vmem [shape: f32[24,4], index: 1, kind: output, shape index: {}]  }
   0x1   :  { %v4_v0 = vld [vmem:[%s34_s0] ss:$0 sm:$0xff] }
   0x2   :  { %5 = vst [vmem:[%s35_s1] sm:$0xff] %v4_v0 }
   0x3   :  { %10 = vst [vmem:[%s35_s1 + $0x8] sm:$0xff] %v4_v0 }
   0x4   :  { %11 = vst [vmem:[%s35_s1 + $0x10] sm:$0xff] %v4_v0 }

// kernel: tile.43
= control target key start
LH: loop header
LB: loop body
LE: loop exit
PB: predicated region body
PF: predicated region fallthrough
CT: control target
= control target key end

     0   :  { %s195_s10 = smov 92   ;;  %s196_s11 = smov 84   ;;  %vm3_vm0 = vcmask 31744   ;;  %vm9_vm1 = vcmask 786144   ;;  %vm15_vm2 = vcmask 753344   ;;  %vm21_vm3 = vcmask 720544   ;;  %s303_s0 = inlined_call_operand.vmem [shape: f32[24,4], index: 0, kind: input, shape index: {}]   ;;  %s304_s1 = inlined_call_operand.vmem [shape: f32[1,96], index: 1, kind: output, shape index: {}]  }
   0x1   :  { %v149_v0 = vld [vmem:[%s303_s0 + $0x17] sm:$0x1]   ;;  %v151_v1 = vld [vmem:[%s303_s0 + $0x15] sm:$0x1]   ;;  %v153_v2 = vld [vmem:[%s303_s0 + $0x13] sm:$0x1]  }
   0x2   :  { %7 = vrot.lane.b32.xlu0 %v149_v0, %s195_s10  ;;  %19 = vrot.lane.b32.xlu1 %v151_v1, %s196_s11  ;;  %s197_s14 = smov 76   ;;  %v150_v3 = vld [vmem:[%s303_s0 + $0x16] sm:$0x1]   ;;  %v152_v4 = vld [vmem:[%s303_s0 + $0x14] sm:$0x1]   ;;  %s198_s19 = smov 88  }
   0x3   :  { %31 = vrot.lane.b32.xlu2 %v153_v2, %s197_s14  ;;  %s199_s20 = smov 80   ;;  %v154_v5 = vld [vmem:[%s303_s0 + $0x12] sm:$0x1]   ;;  %s200_s23 = smov 72   ;;  %v155_v6 = vld [vmem:[%s303_s0 + $0x11] sm:$0x1]  }
   0x4   :  { %v156_v7 = vld [vmem:[%s303_s0 + $0x10] sm:$0x1]   ;;  %s201_s28 = smov 68   ;;  %s202_s29 = smov 64   ;;  %v157_v8 = vld [vmem:[%s303_s0 + $0xf] sm:$0x1]  }
   0x5   :  { %s203_s3 = smov 60   ;;  %v158_v9 = vld [vmem:[%s303_s0 + $0xe] sm:$0x1]   ;;  %v159_v10 = vld [vmem:[%s303_s0 + $0xd] sm:$0x1]   ;;  %s204_s8 = smov 56  }
   0x6   :  { %s205_s9 = smov 52   ;;  %v160_v11 = vld [vmem:[%s303_s0 + $0xc] sm:$0x1]   ;;  %s206_s12 = smov 48   ;;  %v161_v12 = vld [vmem:[%s303_s0 + $0xb] sm:$0x1]  }
   0x7   :  { %v162_v13 = vld [vmem:[%s303_s0 + $0xa] sm:$0x1]   ;;  %s207_s17 = smov 44   ;;  %s208_s18 = smov 40   ;;  %v163_v14 = vld [vmem:[%s303_s0 + $0x9] sm:$0x1]  }
   0x8   :  { %s209_s21 = smov 36   ;;  %v164_v15 = vld [vmem:[%s303_s0 + $0x8] sm:$0x1]   ;;  %v165_v16 = vld [vmem:[%s303_s0 + $0x7] sm:$0x1]   ;;  %s210_s26 = smov 32  }
   0x9   :  { %s211_s27 = smov 28   ;;  %v166_v17 = vld [vmem:[%s303_s0 + $0x6] sm:$0x1]   ;;  %s212_s30 = smov 24   ;;  %v167_v18 = vld [vmem:[%s303_s0 + $0x5] sm:$0x1]  }
   0xa   :  { %13 = vrot.lane.b32.xlu0 %v150_v3, %s198_s19  ;;  %25 = vrot.lane.b32.xlu1 %v152_v4, %s199_s20  ;;  %v168_v19 = vld [vmem:[%s303_s0 + $0x4] sm:$0x1]   ;;  %s213_s6 = smov 20   ;;  %s214_s7 = smov 16   ;;  %v169_v20 = vld [vmem:[%s303_s0 + $0x3] sm:$0x1]  }
   0xb   :  { %37 = vrot.lane.b32.xlu2 %v154_v5, %s200_s23  ;;  %s215_s10 = smov 12   ;;  %v170_v21 = vld [vmem:[%s303_s0 + $0x2] sm:$0x1]   ;;  %v171_v22 = vld [vmem:[%s303_s0 + $0x1] sm:$0x1]   ;;  %s216_s15 = smov 8  }
   0xc   :  { %s217_s16 = smov 4   ;;  %v2_v23 = vld [vmem:[%s303_s0] sm:$0x1]   ;;  %vm27_vm4 = vcmask 687744   ;;  %vm33_vm5 = vcmask 654944   ;;  %vm39_vm6 = vcmask 622144  }
   0xd   :  { %4 = vst.msk [vmem:[#allocation0] sm:$0x1] %vm3_vm0, %v2_v23   ;;  %vm45_vm7 = vcmask 589344   ;;  %vm51_vm8 = vcmask 556544   ;;  %vm57_vm9 = vcmask 523744   ;;  %vm63_vm10 = vcmask 490944  }
   0xe   :  { %vm69_vm11 = vcmask 458144   ;;  %vm75_vm12 = vcmask 425344   ;;  %vm81_vm13 = vcmask 392544   ;;  %vm87_vm14 = vcmask 359744  }
   0xf   :  { %vm93_vm15 = vcmask 326944   ;;  %vm99_vm0 = vcmask 294144  }
  0x12   :  { %43 = vrot.lane.b32.xlu0 %v155_v6, %s201_s28  ;;  %49 = vrot.lane.b32.xlu1 %v156_v7, %s202_s29 }
  0x13   :  { %55 = vrot.lane.b32.xlu2 %v157_v8, %s203_s3 }
  0x1a   :  { %61 = vrot.lane.b32.xlu0 %v158_v9, %s204_s8  ;;  %67 = vrot.lane.b32.xlu1 %v159_v10, %s205_s9 }
  0x1b   :  { %73 = vrot.lane.b32.xlu2 %v160_v11, %s206_s12 }
  0x22   :  { %79 = vrot.lane.b32.xlu0 %v161_v12, %s207_s17  ;;  %85 = vrot.lane.b32.xlu1 %v162_v13, %s208_s18 }
  0x23   :  { %91 = vrot.lane.b32.xlu2 %v163_v14, %s209_s21 }
  0x2a   :  { %97 = vrot.lane.b32.xlu0 %v164_v15, %s210_s26  ;;  %103 = vrot.lane.b32.xlu1 %v165_v16, %s211_s27 }
  0x2b   :  { %109 = vrot.lane.b32.xlu2 %v166_v17, %s212_s30 }
  0x32   :  { %115 = vrot.lane.b32.xlu0 %v167_v18, %s213_s6  ;;  %121 = vrot.lane.b32.xlu1 %v168_v19, %s214_s7 }
  0x33   :  { %127 = vrot.lane.b32.xlu2 %v169_v20, %s215_s10 }
  0x3a   :  { %133 = vrot.lane.b32.xlu0 %v170_v21, %s216_s15  ;;  %139 = vrot.lane.b32.xlu1 %v171_v22, %s217_s16 }
  0x5d   :  { %v32_v24 = vpop.permute.xlu2 %31  }
  0x65   :  { %v38_v25 = vpop.permute.xlu2 %37  }
  0x6d   :  { %v56_v26 = vpop.permute.xlu2 %55  }
  0x74   :  { %v8_v27 = vpop.permute.xlu0 %7   ;;  %v20_v28 = vpop.permute.xlu1 %19  }
  0x75   :  { %10 = vst.msk [vmem:[#allocation0] sm:$0x1] %vm9_vm1, %v8_v27   ;;  %v74_v29 = vpop.permute.xlu2 %73   ;;  %vm105_vm1 = vcmask 261344  }
  0x7c   :  { %v14_v30 = vpop.permute.xlu0 %13   ;;  %v26_v31 = vpop.permute.xlu1 %25  }
  0x7d   :  { %16 = vst.msk [vmem:[#allocation0] sm:$0x1] %vm15_vm2, %v14_v30   ;;  %v92_v32 = vpop.permute.xlu2 %91   ;;  %vm111_vm2 = vcmask 228544  }
  0x7e   :  { %22 = vst.msk [vmem:[#allocation0] sm:$0x1] %vm21_vm3, %v20_v28   ;;  %vm117_vm3 = vcmask 195744  }
  0x7f   :  { %28 = vst.msk [vmem:[#allocation0] sm:$0x1] %vm27_vm4, %v26_v31   ;;  %vm123_vm4 = vcmask 162944  }
  0x80   :  { %34 = vst.msk [vmem:[#allocation0] sm:$0x1] %vm33_vm5, %v32_v24   ;;  %vm129_vm5 = vcmask 130144  }
  0x81   :  { %40 = vst.msk [vmem:[#allocation0] sm:$0x1] %vm39_vm6, %v38_v25   ;;  %vm135_vm6 = vcmask 97344  }
  0x84   :  { %v44_v33 = vpop.permute.xlu0 %43   ;;  %v50_v34 = vpop.permute.xlu1 %49  }
  0x85   :  { %46 = vst.msk [vmem:[#allocation0] sm:$0x1] %vm45_vm7, %v44_v33   ;;  %v110_v35 = vpop.permute.xlu2 %109   ;;  %vm141_vm7 = vcmask 64544  }
  0x86   :  { %52 = vst.msk [vmem:[#allocation0] sm:$0x1] %vm51_vm8, %v50_v34  }
  0x87   :  { %58 = vst.msk [vmem:[#allocation0] sm:$0x1] %vm57_vm9, %v56_v26  }
  0x8c   :  { %v62_v36 = vpop.permute.xlu0 %61   ;;  %v68_v37 = vpop.permute.xlu1 %67  }
  0x8d   :  { %64 = vst.msk [vmem:[#allocation0] sm:$0x1] %vm63_vm10, %v62_v36   ;;  %v128_v38 = vpop.permute.xlu2 %127  }
  0x8e   :  { %70 = vst.msk [vmem:[#allocation0] sm:$0x1] %vm69_vm11, %v68_v37  }
  0x8f   :  { %76 = vst.msk [vmem:[#allocation0] sm:$0x1] %vm75_vm12, %v74_v29  }
  0x94   :  { %v80_v39 = vpop.permute.xlu0 %79   ;;  %v86_v40 = vpop.permute.xlu1 %85  }
  0x95   :  { %82 = vst.msk [vmem:[#allocation0] sm:$0x1] %vm81_vm13, %v80_v39  }
  0x96   :  { %88 = vst.msk [vmem:[#allocation0] sm:$0x1] %vm87_vm14, %v86_v40  }
  0x97   :  { %94 = vst.msk [vmem:[#allocation0] sm:$0x1] %vm93_vm15, %v92_v32  }
  0x9c   :  { %v98_v41 = vpop.permute.xlu0 %97   ;;  %v104_v42 = vpop.permute.xlu1 %103  }
  0x9d   :  { %100 = vst.msk [vmem:[#allocation0] sm:$0x1] %vm99_vm0, %v98_v41  }
  0x9e   :  { %106 = vst.msk [vmem:[#allocation0] sm:$0x1] %vm105_vm1, %v104_v42  }
  0x9f   :  { %112 = vst.msk [vmem:[#allocation0] sm:$0x1] %vm111_vm2, %v110_v35  }
  0xa4   :  { %v116_v43 = vpop.permute.xlu0 %115   ;;  %v122_v44 = vpop.permute.xlu1 %121  }
  0xa5   :  { %118 = vst.msk [vmem:[#allocation0] sm:$0x1] %vm117_vm3, %v116_v43  }
  0xa6   :  { %124 = vst.msk [vmem:[#allocation0] sm:$0x1] %vm123_vm4, %v122_v44  }
  0xa7   :  { %130 = vst.msk [vmem:[#allocation0] sm:$0x1] %vm129_vm5, %v128_v38  }
  0xac   :  { %v134_v45 = vpop.permute.xlu0 %133   ;;  %v140_v46 = vpop.permute.xlu1 %139  }
  0xad   :  { %136 = vst.msk [vmem:[#allocation0] sm:$0x1] %vm135_vm6, %v134_v45  }
  0xae   :  { %142 = vst.msk [vmem:[#allocation0] sm:$0x1] %vm141_vm7, %v140_v46  }
  0xb5   :  { %v145_v47 = vld [vmem:[#allocation0] sm:$0x1] }
  0xb6   :  { %148 = vst [vmem:[%s304_s1] sm:$0x1] %v145_v47 }

// kernel: decoder_block_forward.5
= control target key start
LH: loop header
LB: loop body
LE: loop exit
PB: predicated region body
PF: predicated region fallthrough
CT: control target
= control target key end

     0   :  { %s582_s18 = smov 0   ;;  %s651_s0 = inlined_call_operand.vmem [shape: bf16[2,12,96], index: 0, kind: input, shape index: {}]   ;;  %s652_s1 = inlined_call_operand.vmem [shape: f32[1,96], index: 1, kind: input, shape index: {}]   ;;  %s653_s2 = inlined_call_operand.vmem [shape: f32[1,96], index: 2, kind: input, shape index: {}]   ;;  %s654_s3 = inlined_call_operand.vmem [shape: bf16[2,96,96], index: 3, kind: input, shape index: {}]   ;;  %s655_s4 = inlined_call_operand.vmem [shape: f32[1,96], index: 4, kind: input, shape index: {}]   ;;  %s656_s5 = inlined_call_operand.vmem [shape: f32[2,2,12,96], index: 5, kind: output, shape index: {}]  }
   0x1 LB: > { %s443_s19 = sadd.s32 4294967295, %s550_s18   ;;  %p447_p0 = scmp.ge.s32.totalorder %s550_s18, 1  ;;  %s550_s18 = sphi %s582_s18, %s15_s18  }
   0x2   : > { %p187_p1 = scmp.lt.s32.totalorder %s550_s18, 3 }
   0x4   : > { %p188_p2 = pnand %p447_p0, %p187_p1 }
   0x5   : > { %p215_p3 = scmp.lt.s32.totalorder (!%p188_p2), %s443_s19, 1 }
   0x6   : > { %191 = sbr.rel (%p188_p2) target bundleno = 173 (0xad), region = 40 }
   0xb   : > { %v525_v0 = vld [vmem:[%s654_s3 + $0x28] sm:$0xff]  ;;  %v531_v1 = vld [vmem:[%s654_s3 + $0x58] sm:$0xff]  ;;  %v524_v2 = vld [vmem:[%s654_s3 + $0x20] sm:$0xff]  ;;  %s658_s19 = smov (!%p215_p3, %s443_s19), 1  ;;  %vm297_vm0 = vcmask 785408   ;;  %vm316_vm1 = vcmask 781312  }
   0xc   : > { %303 = vmatpush.bf16.msra.mxu0 %v525_v0  ;;  %373 = vmatpush.bf16.msra.mxu1 %v531_v1  ;;  %v530_v3 = vld [vmem:[%s654_s3 + $0x50] sm:$0xff]  ;;  %v523_v4 = vld [vmem:[%s654_s3 + $0x18] sm:$0xff]  ;;  %s518_s30 = sshll.u32 %s658_s19, 3  ;;  %v540_v5 = vld [vmem:[%s652_s1] ss:$0 sm:$0xff]  ;;  %s519_s29 = sshll.u32 %s658_s19, 5 }
   0xd   : > { %s219_s8 = scalar_lea.vmem %s651_s0, %s518_s30  ;;  %v529_v6 = vld [vmem:[%s654_s3 + $0x48] sm:$0xff]  ;;  %v541_v13 = vld [vmem:[%s653_s2] ss:$0 sm:$0xff]  ;;  %v522_v14 = vld [vmem:[%s654_s3 + $0x10] sm:$0xff]  ;;  %s224_s11 = scalar_lea.vmem %s656_s5, %s519_s29 }
   0xe   : > { %v226_v7 = vld [vmem:[%s219_s8] sm:$0xf]  ;;  %v227_v8 = vld [vmem:[%s219_s8 + $0x4] sm:$0x3]  ;;  %v521_v18 = vld [vmem:[%s654_s3 + $0x8] sm:$0xff] }
   0xf   : > { %v228_v9 = vunpack.c.l.bf16 %v226_v7  ;;  %v229_v10 = vunpack.c.l.bf16 %v227_v8  ;;  %v528_v15 = vld [vmem:[%s654_s3 + $0x40] sm:$0xff]  ;;  %v527_v19 = vld [vmem:[%s654_s3 + $0x38] sm:$0xff]  ;;  %v526_v23 = vld [vmem:[%s654_s3 + $0x30] sm:$0xff] }
  0x10   : > { %304 = vmatpush.bf16.msra.mxu0 %v524_v2  ;;  %374 = vmatpush.bf16.msra.mxu1 %v530_v3  ;;  %v520_v22 = vld [vmem:[%s654_s3] sm:$0xff] }
  0x11   : > { %v234_v11 = vmul.f32 %v540_v5, %v228_v9  ;;  %v235_v12 = vmul.f32 %v540_v5, %v229_v10  ;;  %v542_v25 = vld [vmem:[%s655_s4] ss:$0 sm:$0xff] }
  0x12   : > { %v543_v26 = vld [vmem:[%s655_s4] ss:$0 sm:$0xff] }
  0x13   : > { %v240_v16 = vadd.f32 %v541_v13, %v234_v11  ;;  %v241_v17 = vadd.f32 %v541_v13, %v235_v12 }
  0x14   : > { %305 = vmatpush.bf16.msra.mxu0 %v523_v4  ;;  %375 = vmatpush.bf16.msra.mxu1 %v529_v6 }
  0x15   : > { %v242_v20 = vmax.f32 %v240_v16, 0.0  ;;  %v243_v21 = vmax.f32 %v241_v17, 0.0 }
  0x17   : > { %v244_v24 = vpack.c.bf16 %v243_v21, %v242_v20 }
  0x18   : > { %306 = vmatpush.bf16.msra.mxu0 %v522_v14  ;;  %376 = vmatpush.bf16.msra.mxu1 %v528_v15 }
  0x1c   : > { %307 = vmatpush.bf16.msra.mxu0 %v521_v18  ;;  %377 = vmatpush.bf16.msra.mxu1 %v527_v19 }
  0x20   : > { %308 = vmatpush.bf16.msra.mxu0 %v520_v22  ;;  %378 = vmatpush.bf16.msra.mxu1 %v526_v23 }
  0x23   : > { %476 = vmatmul.msk.bf16.vlgmr.msra.gmra.mxu0 %vm297_vm0, %v244_v24  ;;  %513 = vmatmul.msk.bf16.vlgmr.msra.gmra.mxu1 %vm297_vm0, %v244_v24 }
  0xa0   : > { %v310_v27 = vpop.f32.mrf.mxu0  ;;  %v380_v28 = vpop.f32.mrf.mxu1 }
  0xa1   : > { %v311_v29 = vadd.f32 %v542_v25, %v310_v27  ;;  %v381_v30 = vadd.f32 %v543_v26, %v380_v28 }
  0xa3   : > { %315 = vst.msk [vmem:[%s224_s11] sm:$0xff] %vm297_vm0, %v311_v29 }
  0xa4   : > { %514 = vst.msk [vmem:[%s224_s11 + $0x10] sm:$0xff] %vm297_vm0, %v381_v30 }
  0xa8   : > { %v312_v31 = vpop.f32.mrf.mxu0  ;;  %v382_v32 = vpop.f32.mrf.mxu1 }
  0xa9   : > { %v313_v33 = vadd.f32 %v542_v25, %v312_v31  ;;  %v383_v34 = vadd.f32 %v543_v26, %v382_v32 }
  0xab   : > { %317 = vst.msk [vmem:[%s224_s11 + $0x8] sm:$0xf] %vm316_vm1, %v313_v33 }
  0xac   : > { %515 = vst.msk [vmem:[%s224_s11 + $0x18] sm:$0xf] %vm316_vm1, %v383_v34 }
  0xad PF: > { %s15_s18 = sadd.s32 1, %s550_s18  }
  0xae   : > { %p12_p4 = scmp.ge.s32.totalorder %s15_s18, 4  }
  0xb0   :  { %14 = sbr.rel (!%p12_p4) target bundleno = 1 (0x1), region = 72 }

</bundles_post_ra>
